<compile_context>
chip_gen: v5e
topology: v5e:2x2
jax: 0.10.0
libtpu: 0.0.40
codegen_flags: <defaults>
</compile_context>

<pallas_src>
import math
from functools import partial

import jax
import jax.numpy as jnp
from jax import lax
from jax.experimental import pallas as pl
from jax.experimental.pallas import tpu as pltpu

# ---------------- config (small, BERT-shaped) ----------------
VOCAB_SIZE = 100
HIDDEN = 128
NUM_HEADS = 4
HEAD_DIM = HIDDEN // NUM_HEADS
INTERMEDIATE = 256
NUM_LAYERS = 2
MAX_POS = 16
TYPE_VOCAB = 2
LN_EPS = 1e-12
VEC_COLS = 6 * HIDDEN + INTERMEDIATE   # bo | ln1_g | ln1_b | bi | bo2 | ln2_g | ln2_b


# ---------------- shared fp32 elementwise helpers ----------------
def _gelu(x):
    # tanh-approximate GELU (HF default is erf; ~1e-3 deviation).
    c = math.sqrt(2.0 / math.pi)
    return 0.5 * x * (1.0 + jnp.tanh(c * (x + 0.044715 * x * x * x)))


def _layernorm(x, g, b):
    mean = jnp.mean(x, axis=-1, keepdims=True)
    xc = x - mean
    var = jnp.mean(xc * xc, axis=-1, keepdims=True)
    return xc * lax.rsqrt(var + LN_EPS) * g + b


# ---------------- fused whole-encoder kernel ----------------
def _encoder_kernel(x_emb_ref, mask_ref, eg_ref, eb_ref,
                    wqkv_ref, bqkv_ref, wo_ref, wi_ref, wo2_ref, vecs_ref,
                    o_ref,
                    x_scr, qkv_scr, attn_scr,
                    *, batch, seq, num_heads, head_dim, hidden, inter):
    B, S, NH, DH, H, I = batch, seq, num_heads, head_dim, hidden, inter
    l = pl.program_id(0)
    n_layers = pl.num_programs(0)

    # ---- layer-0 prologue: embedding LayerNorm straight into resident state ----
    @pl.when(l == 0)
    def _():
        x_scr[...] = _layernorm(x_emb_ref[...], eg_ref[...], eb_ref[...])

    # ---- unpack the packed per-layer small vectors (single DMA descriptor) ----
    bo = vecs_ref[:, 0:H]                       # (1, H)
    g1 = vecs_ref[:, H:2 * H]
    b1 = vecs_ref[:, 2 * H:3 * H]
    bi = vecs_ref[:, 3 * H:3 * H + I]           # (1, I)
    bo2 = vecs_ref[:, 3 * H + I:4 * H + I]
    g2 = vecs_ref[:, 4 * H + I:5 * H + I]
    b2 = vecs_ref[:, 5 * H + I:6 * H + I]

    x = x_scr[...]                              # (B*S, H) fp32, resident across layers
    xb = x.astype(jnp.bfloat16)

    # ---- per-head QKV projections into a head-major bf16 scratch ----
    # qkv_scr slot layout: b*3*NH + kind*NH + h, kind 0=Q, 1=K, 2=V.
    # Q weights/biases carry the folded 1/sqrt(head_dim) scale.
    def qkv_body(j, carry):
        proj = (jnp.dot(xb, wqkv_ref[j], preferred_element_type=jnp.float32)
                + bqkv_ref[j]).astype(jnp.bfloat16)          # (B*S, DH)
        for b in range(B):                                    # static batch split
            qkv_scr[b * 3 * NH + j] = proj[b * S:(b + 1) * S, :]
        return carry

    lax.fori_loop(0, 3 * NH, qkv_body, 0)

    # ---- self-attention: per sequence, fori over heads; lane-dense accumulation ----
    for b in range(B):                                        # static python loop
        rows = slice(b * S, (b + 1) * S)
        base = b * 3 * NH
        bias_sb = jnp.broadcast_to(mask_ref[b], (S, S))       # hoisted out of head loop

        def head_body(h, acc, base=base, bias_sb=bias_sb):
            q = qkv_scr[base + h]                             # (S, DH) bf16, leading-dim view
            k = qkv_scr[base + NH + h]
            v = qkv_scr[base + 2 * NH + h]
            # contract head_dim directly (q @ k^T, no explicit transpose)
            s = lax.dot_general(q, k, (((1,), (1,)), ((), ())),
                                preferred_element_type=jnp.float32)
            s = s + bias_sb
            s = s - jnp.max(s, axis=-1, keepdims=True)
            p = jnp.exp(s)
            p = p * pl.reciprocal(jnp.sum(p, axis=-1, keepdims=True), approx=True)
            ctx = jnp.dot(p.astype(jnp.bfloat16), v,
                          preferred_element_type=jnp.float32)  # (S, DH)
            # fold the head back in via its Wo row-block: lane-dense (S, H) contribution
            return acc + jnp.dot(ctx.astype(jnp.bfloat16), wo_ref[h],
                                 preferred_element_type=jnp.float32)

        acc0 = jnp.zeros((S, H), jnp.float32)
        attn_scr[rows, :] = lax.fori_loop(0, NH, head_body, acc0)   # full-lane row store

    # ---- attention output bias + residual LayerNorm ----
    x1 = _layernorm(attn_scr[...] + bo + x, g1, b1)

    # ---- FFN (GELU) + residual LayerNorm ----
    h1 = _gelu(jnp.dot(x1.astype(jnp.bfloat16), wi_ref[...],
                       preferred_element_type=jnp.float32) + bi)
    ffn = jnp.dot(h1.astype(jnp.bfloat16), wo2_ref[...],
                  preferred_element_type=jnp.float32) + bo2
    x2 = _layernorm(ffn + x1, g2, b2)

    # carry only when another layer follows; last layer writes the output block
    @pl.when(l < n_layers - 1)
    def _():
        x_scr[...] = x2

    @pl.when(l == n_layers - 1)
    def _():
        o_ref[...] = x2


# ---------------- VMEM budget (generation-aware) ----------------
def _vmem_limit_bytes():
    try:
        cap = int(pltpu.get_tpu_info().vmem_capacity_bytes)
        return max(32 << 20, min(int(cap * 0.8), 112 << 20))
    except Exception:
        return 32 << 20


# ---------------- parameter init (deterministic, synthetic, torch-like layout) ----------------
def init_params(key):
    def nrm(k, shape, std=0.02):
        return std * jax.random.normal(k, shape, dtype=jnp.float32)

    keys = jax.random.split(key, 6)
    lkeys = jax.random.split(keys[5], NUM_LAYERS)

    def layer(k):
        ks = jax.random.split(k, 16)
        return dict(
            wq=nrm(ks[0], (HIDDEN, HIDDEN)), bq=nrm(ks[1], (HIDDEN,)),
            wk=nrm(ks[2], (HIDDEN, HIDDEN)), bk=nrm(ks[3], (HIDDEN,)),
            wv=nrm(ks[4], (HIDDEN, HIDDEN)), bv=nrm(ks[5], (HIDDEN,)),
            wo=nrm(ks[6], (HIDDEN, HIDDEN)), bo=nrm(ks[7], (HIDDEN,)),
            ln1_g=1.0 + nrm(ks[8], (HIDDEN,)), ln1_b=nrm(ks[9], (HIDDEN,)),
            wi=nrm(ks[10], (HIDDEN, INTERMEDIATE)), bi=nrm(ks[11], (INTERMEDIATE,)),
            wo2=nrm(ks[12], (INTERMEDIATE, HIDDEN)), bo2=nrm(ks[13], (HIDDEN,)),
            ln2_g=1.0 + nrm(ks[14], (HIDDEN,)), ln2_b=nrm(ks[15], (HIDDEN,)),
        )

    layers = [layer(k) for k in lkeys]
    stacked = {name: jnp.stack([lyr[name] for lyr in layers], axis=0)
               for name in layers[0]}

    params = {
        "word_emb": nrm(keys[0], (VOCAB_SIZE, HIDDEN)),
        "pos_emb": nrm(keys[1], (MAX_POS, HIDDEN)),
        "type_emb": nrm(keys[2], (TYPE_VOCAB, HIDDEN)),
        "emb_ln_g": 1.0 + nrm(keys[3], (1, HIDDEN)),
        "emb_ln_b": nrm(keys[4], (1, HIDDEN)),
    }
    params.update(stacked)
    return params


# ---------------- pack canonical params into kernel layout ----------------
def pack_kernel_params(params):
    L, H, NH, DH, I = NUM_LAYERS, HIDDEN, NUM_HEADS, HEAD_DIM, INTERMEDIATE
    scale = 1.0 / math.sqrt(DH)

    def col_head_major(w):                       # (L, H, H) -> (L, NH, H, DH)
        return w.reshape(L, H, NH, DH).transpose(0, 2, 1, 3)

    wqkv = jnp.concatenate([col_head_major(params["wq"] * scale),   # scale folded into Q
                            col_head_major(params["wk"]),
                            col_head_major(params["wv"])], axis=1)   # (L, 3NH, H, DH)
    bqkv = jnp.concatenate([(params["bq"] * scale).reshape(L, NH, 1, DH),
                            params["bk"].reshape(L, NH, 1, DH),
                            params["bv"].reshape(L, NH, 1, DH)], axis=1)
    wo_hm = params["wo"].reshape(L, NH, DH, H)                       # row head-major
    vecs = jnp.concatenate([params["bo"], params["ln1_g"], params["ln1_b"],
                            params["bi"], params["bo2"],
                            params["ln2_g"], params["ln2_b"]], axis=-1)  # (L, 6H+I)
    return dict(
        wqkv=wqkv.astype(jnp.bfloat16),
        bqkv=bqkv.astype(jnp.float32),
        wo=wo_hm.astype(jnp.bfloat16),
        wi=params["wi"].astype(jnp.bfloat16),
        wo2=params["wo2"].astype(jnp.bfloat16),
        vecs=vecs[:, None, :].astype(jnp.float32),                    # (L, 1, 6H+I)
    )


# ---------------- forward (== BertEncoder.forward -> last_hidden_state) ----------------
def bert_encoder_forward(params, input_ids, attn_mask):
    B, S = input_ids.shape
    H, I, L, NH, DH = HIDDEN, INTERMEDIATE, NUM_LAYERS, NUM_HEADS, HEAD_DIM
    M = B * S

    # embedding gathers stay as JAX glue (no clean BlockSpec gather)
    emb = (params["word_emb"][input_ids]
           + params["pos_emb"][:S][None, :, :]
           + params["type_emb"][0][None, None, :]).astype(jnp.float32)
    x_emb = emb.reshape(M, H)
    mask_bias = ((1.0 - attn_mask.astype(jnp.float32)) * -10000.0).reshape(B, 1, S)

    kp = pack_kernel_params(params)

    kernel = partial(_encoder_kernel, batch=B, seq=S, num_heads=NH,
                     head_dim=DH, hidden=H, inter=I)

    out = pl.pallas_call(
        kernel,
        out_shape=jax.ShapeDtypeStruct((M, H), jnp.float32),
        grid=(L,),
        in_specs=[
            pl.BlockSpec((M, H), lambda l: (0, 0)),                    # embeddings (used at l==0)
            pl.BlockSpec((B, 1, S), lambda l: (0, 0, 0)),              # additive attention mask
            pl.BlockSpec((1, H), lambda l: (0, 0)),                    # emb LN gamma
            pl.BlockSpec((1, H), lambda l: (0, 0)),                    # emb LN beta
            pl.BlockSpec((None, 3 * NH, H, DH), lambda l: (l, 0, 0, 0)),  # QKV weights, head-major, bf16
            pl.BlockSpec((None, 3 * NH, 1, DH), lambda l: (l, 0, 0, 0)),  # QKV biases, head-major
            pl.BlockSpec((None, NH, DH, H), lambda l: (l, 0, 0, 0)),      # Wo, head-major, bf16
            pl.BlockSpec((None, H, I), lambda l: (l, 0, 0)),              # Wi, bf16
            pl.BlockSpec((None, I, H), lambda l: (l, 0, 0)),              # Wo2, bf16
            pl.BlockSpec((None, 1, VEC_COLS), lambda l: (l, 0, 0)),       # packed small vectors
        ],
        out_specs=pl.BlockSpec((M, H), lambda l: (0, 0)),
        scratch_shapes=[
            pltpu.VMEM((M, H), jnp.float32),                 # resident hidden state
            pltpu.VMEM((B * 3 * NH, S, DH), jnp.bfloat16),   # head-major Q/K/V (bf16)
            pltpu.VMEM((M, H), jnp.float32),                 # attention-output accumulator
        ],
        compiler_params=pltpu.CompilerParams(
            dimension_semantics=("arbitrary",),
            vmem_limit_bytes=_vmem_limit_bytes()),
    )(x_emb, mask_bias, params["emb_ln_g"], params["emb_ln_b"],
      kp["wqkv"], kp["bqkv"], kp["wo"], kp["wi"], kp["wo2"], kp["vecs"])

    return out.reshape(B, S, H)


# ---------------- pure-JAX reference (standard layout, mirrors bf16 matmul inputs) ----------------
def bert_encoder_reference(params, input_ids, attn_mask):
    B, S = input_ids.shape
    H, NH, DH = HIDDEN, NUM_HEADS, HEAD_DIM

    emb = (params["word_emb"][input_ids]
           + params["pos_emb"][:S][None, :, :]
           + params["type_emb"][0][None, None, :]).astype(jnp.float32)
    x = emb.reshape(B * S, H)
    x = _layernorm(x, params["emb_ln_g"], params["emb_ln_b"])

    def mm(a, w, b):
        return jnp.dot(a.astype(jnp.bfloat16), w.astype(jnp.bfloat16),
                       preferred_element_type=jnp.float32) + b

    bias = (1.0 - attn_mask.astype(jnp.float32)) * -10000.0          # (B, S)
    for l in range(NUM_LAYERS):
        q = mm(x, params["wq"][l], params["bq"][l])
        k = mm(x, params["wk"][l], params["bk"][l])
        v = mm(x, params["wv"][l], params["bv"][l])

        def heads(t):
            return t.reshape(B, S, NH, DH).transpose(0, 2, 1, 3)

        qh, kh, vh = heads(q), heads(k), heads(v)
        s = jnp.einsum("bhqd,bhkd->bhqk", qh.astype(jnp.bfloat16),
                       kh.astype(jnp.bfloat16),
                       preferred_element_type=jnp.float32) / math.sqrt(DH)
        s = s + bias[:, None, None, :]
        p = jax.nn.softmax(s, axis=-1)
        ctx = jnp.einsum("bhqk,bhkd->bhqd", p.astype(jnp.bfloat16),
                         vh.astype(jnp.bfloat16), preferred_element_type=jnp.float32)
        ctx = ctx.transpose(0, 2, 1, 3).reshape(B * S, H)
        attn_out = mm(ctx, params["wo"][l], params["bo"][l])
        x = _layernorm(attn_out + x, params["ln1_g"][l], params["ln1_b"][l])
        inter = _gelu(mm(x, params["wi"][l], params["bi"][l]))
        ffn = mm(inter, params["wo2"][l], params["bo2"][l])
        x = _layernorm(ffn + x, params["ln2_g"][l], params["ln2_b"][l])
    return x.reshape(B, S, HIDDEN)


if __name__ == "__main__":
    key = jax.random.PRNGKey(0)
    pkey, ikey = jax.random.split(key)
    params = init_params(pkey)

    B, S = 2, 8
    input_ids = jax.random.randint(ikey, (B, S), 0, VOCAB_SIZE, dtype=jnp.int32)
    # attention mask: second sequence has 2 padding positions
    attn_mask = jnp.array([[1] * S, [1] * (S - 2) + [0] * 2], dtype=jnp.int32)

    encodings = jax.jit(bert_encoder_forward)(params, input_ids, attn_mask)
    jax.block_until_ready(encodings)
    assert encodings.shape == (B, S, HIDDEN)
    assert bool(jnp.all(jnp.isfinite(encodings)))

    ref = bert_encoder_reference(params, input_ids, attn_mask)
    max_err = float(jnp.max(jnp.abs(encodings - ref)))
    assert bool(jnp.allclose(encodings, ref, atol=2e-2, rtol=2e-2)), max_err

    print("KERNEL_OK")
</pallas_src>

<mosaic_0001>
module attributes {stable_mosaic.version = 11 : i64} {
  func.func @_encoder_kernel(%arg0: i32, %arg1: memref<16x128xf32, #tpu.memory_space<vmem>>, %arg2: memref<2x1x8xf32, #tpu.memory_space<vmem>>, %arg3: memref<1x128xf32, #tpu.memory_space<vmem>>, %arg4: memref<1x128xf32, #tpu.memory_space<vmem>>, %arg5: memref<1x12x128x32xbf16, #tpu.memory_space<vmem>>, %arg6: memref<1x12x1x32xf32, #tpu.memory_space<vmem>>, %arg7: memref<1x4x32x128xbf16, #tpu.memory_space<vmem>>, %arg8: memref<1x128x256xbf16, #tpu.memory_space<vmem>>, %arg9: memref<1x256x128xbf16, #tpu.memory_space<vmem>>, %arg10: memref<1x1x1024xf32, #tpu.memory_space<vmem>>, %arg11: memref<16x128xf32, #tpu.memory_space<vmem>>, %arg12: memref<16x128xf32, #tpu.memory_space<vmem>>, %arg13: memref<24x8x32xbf16, #tpu.memory_space<vmem>>, %arg14: memref<16x128xf32, #tpu.memory_space<vmem>>) attributes {dimension_semantics = [#tpu.dimension_semantics<arbitrary>], iteration_bounds = array<i64: 2>, scalar_prefetch = 0 : i64, scratch_operands = 3 : i64, tpu.core_type = #tpu.core_type<tc>, window_params = [{pipeline_mode = #tpu.pipeline_mode<synchronous>, transform_indices = @transform_0, window_bounds = array<i64: 16, 128>}, {pipeline_mode = #tpu.pipeline_mode<synchronous>, transform_indices = @transform_1, window_bounds = array<i64: 2, 1, 8>}, {pipeline_mode = #tpu.pipeline_mode<synchronous>, transform_indices = @transform_2, window_bounds = array<i64: 1, 128>}, {pipeline_mode = #tpu.pipeline_mode<synchronous>, transform_indices = @transform_3, window_bounds = array<i64: 1, 128>}, {transform_indices = @transform_4, window_bounds = array<i64: 1, 12, 128, 32>}, {transform_indices = @transform_5, window_bounds = array<i64: 1, 12, 1, 32>}, {transform_indices = @transform_6, window_bounds = array<i64: 1, 4, 32, 128>}, {transform_indices = @transform_7, window_bounds = array<i64: 1, 128, 256>}, {transform_indices = @transform_8, window_bounds = array<i64: 1, 256, 128>}, {transform_indices = @transform_9, window_bounds = array<i64: 1, 1, 1024>}, {pipeline_mode = #tpu.pipeline_mode<synchronous>, transform_indices = @transform_10, window_bounds = array<i64: 16, 128>}]} {
    %c0_i32 = arith.constant 0 : i32
    %0 = arith.cmpi eq, %arg0, %c0_i32 : i32
    %1 = arith.extui %0 : i1 to i32
    %c0_i32_0 = arith.constant 0 : i32
    %2 = arith.cmpi ne, %1, %c0_i32_0 : i32
    scf.if %2 {
      %c0_63 = arith.constant 0 : index
      %c0_64 = arith.constant 0 : index
      %112 = vector.load %arg1[%c0_63, %c0_64] : memref<16x128xf32, #tpu.memory_space<vmem>>, vector<16x128xf32>
      %c0_65 = arith.constant 0 : index
      %c0_66 = arith.constant 0 : index
      %113 = vector.load %arg3[%c0_65, %c0_66] : memref<1x128xf32, #tpu.memory_space<vmem>>, vector<1x128xf32>
      %c0_67 = arith.constant 0 : index
      %c0_68 = arith.constant 0 : index
      %114 = vector.load %arg4[%c0_67, %c0_68] : memref<1x128xf32, #tpu.memory_space<vmem>>, vector<1x128xf32>
      %cst_69 = arith.constant dense<0.000000e+00> : vector<16xf32>
      %115 = vector.multi_reduction <add>, %112, %cst_69 [1] : vector<16x128xf32> to vector<16xf32>
      %116 = vector.shape_cast %115 : vector<16xf32> to vector<16x1xf32>
      %cst_70 = arith.constant 1.280000e+02 : f32
      %117 = vector.broadcast %cst_70 : f32 to vector<16x1xf32>
      %118 = arith.divf %116, %117 : vector<16x1xf32>
      %119 = vector.broadcast %118 : vector<16x1xf32> to vector<16x128xf32>
      %120 = arith.subf %112, %119 : vector<16x128xf32>
      %121 = arith.mulf %120, %120 : vector<16x128xf32>
      %cst_71 = arith.constant dense<0.000000e+00> : vector<16xf32>
      %122 = vector.multi_reduction <add>, %121, %cst_71 [1] : vector<16x128xf32> to vector<16xf32>
      %123 = vector.shape_cast %122 : vector<16xf32> to vector<16x1xf32>
      %cst_72 = arith.constant 1.280000e+02 : f32
      %124 = vector.broadcast %cst_72 : f32 to vector<16x1xf32>
      %125 = arith.divf %123, %124 : vector<16x1xf32>
      %cst_73 = arith.constant 9.99999996E-13 : f32
      %126 = vector.broadcast %cst_73 : f32 to vector<16x1xf32>
      %127 = arith.addf %125, %126 : vector<16x1xf32>
      %128 = math.rsqrt %127 : vector<16x1xf32>
      %129 = vector.broadcast %128 : vector<16x1xf32> to vector<16x128xf32>
      %130 = arith.mulf %120, %129 : vector<16x128xf32>
      %131 = vector.broadcast %113 : vector<1x128xf32> to vector<16x128xf32>
      %132 = arith.mulf %130, %131 : vector<16x128xf32>
      %133 = vector.broadcast %114 : vector<1x128xf32> to vector<16x128xf32>
      %134 = arith.addf %132, %133 : vector<16x128xf32>
      %c0_74 = arith.constant 0 : index
      %c0_75 = arith.constant 0 : index
      %135 = vector.load %arg12[%c0_74, %c0_75] : memref<16x128xf32, #tpu.memory_space<vmem>>, vector<16x128xf32>
      tpu.vector_store %arg12[%c0_74, %c0_75], %134 {strides = array<i32>} : memref<16x128xf32, #tpu.memory_space<vmem>>, vector<16x128xf32>,
    } else {
    }
    %c0 = arith.constant 0 : index
    %c0_1 = arith.constant 0 : index
    %c0_2 = arith.constant 0 : index
    %3 = vector.load %arg10[%c0, %c0_1, %c0_2] : memref<1x1x1024xf32, #tpu.memory_space<vmem>>, vector<1x1x128xf32>
    %4 = vector.shape_cast %3 : vector<1x1x128xf32> to vector<1x128xf32>
    %c0_3 = arith.constant 0 : index
    %c0_4 = arith.constant 0 : index
    %c128 = arith.constant 128 : index
    %5 = vector.load %arg10[%c0_3, %c0_4, %c128] : memref<1x1x1024xf32, #tpu.memory_space<vmem>>, vector<1x1x128xf32>
    %6 = vector.shape_cast %5 : vector<1x1x128xf32> to vector<1x128xf32>
    %c0_5 = arith.constant 0 : index
    %c0_6 = arith.constant 0 : index
    %c256 = arith.constant 256 : index
    %7 = vector.load %arg10[%c0_5, %c0_6, %c256] : memref<1x1x1024xf32, #tpu.memory_space<vmem>>, vector<1x1x128xf32>
    %8 = vector.shape_cast %7 : vector<1x1x128xf32> to vector<1x128xf32>
    %c0_7 = arith.constant 0 : index
    %c0_8 = arith.constant 0 : index
    %c384 = arith.constant 384 : index
    %9 = vector.load %arg10[%c0_7, %c0_8, %c384] : memref<1x1x1024xf32, #tpu.memory_space<vmem>>, vector<1x1x256xf32>
    %10 = vector.shape_cast %9 : vector<1x1x256xf32> to vector<1x256xf32>
    %c0_9 = arith.constant 0 : index
    %c0_10 = arith.constant 0 : index
    %c640 = arith.constant 640 : index
    %11 = vector.load %arg10[%c0_9, %c0_10, %c640] : memref<1x1x1024xf32, #tpu.memory_space<vmem>>, vector<1x1x128xf32>
    %12 = vector.shape_cast %11 : vector<1x1x128xf32> to vector<1x128xf32>
    %c0_11 = arith.constant 0 : index
    %c0_12 = arith.constant 0 : index
    %c768 = arith.constant 768 : index
    %13 = vector.load %arg10[%c0_11, %c0_12, %c768] : memref<1x1x1024xf32, #tpu.memory_space<vmem>>, vector<1x1x128xf32>
    %14 = vector.shape_cast %13 : vector<1x1x128xf32> to vector<1x128xf32>
    %c0_13 = arith.constant 0 : index
    %c0_14 = arith.constant 0 : index
    %c896 = arith.constant 896 : index
    %15 = vector.load %arg10[%c0_13, %c0_14, %c896] : memref<1x1x1024xf32, #tpu.memory_space<vmem>>, vector<1x1x128xf32>
    %16 = vector.shape_cast %15 : vector<1x1x128xf32> to vector<1x128xf32>
    %c0_15 = arith.constant 0 : index
    %c0_16 = arith.constant 0 : index
    %17 = vector.load %arg12[%c0_15, %c0_16] : memref<16x128xf32, #tpu.memory_space<vmem>>, vector<16x128xf32>
    %18 = arith.truncf %17 : vector<16x128xf32> to vector<16x128xbf16>
    %c0_i32_17 = arith.constant 0 : i32
    %c12_i32 = arith.constant 12 : i32
    %19 = arith.addi %c0_i32_17, %c12_i32 : i32
    %c1_i32 = arith.constant 1 : i32
    scf.for %arg15 = %c0_i32_17 to %19 step %c1_i32  : i32 {
      %c0_63 = arith.constant 0 : index
      %112 = arith.index_cast %arg15 : i32 to index
      %c0_64 = arith.constant 0 : index
      %c0_65 = arith.constant 0 : index
      %113 = vector.load %arg5[%c0_63, %112, %c0_64, %c0_65] : memref<1x12x128x32xbf16, #tpu.memory_space<vmem>>, vector<1x1x128x32xbf16>
      %114 = vector.shape_cast %113 : vector<1x1x128x32xbf16> to vector<128x32xbf16>
      %cst_66 = arith.constant dense<0.000000e+00> : vector<16x32xf32>
      %115 = tpu.matmul %18, %114, %cst_66 {dimension_numbers = #tpu.dot_dimension_numbers<[1], [0], [0], [1], [0, 0, 1, 1], [], []>} : vector<16x128xbf16>, vector<128x32xbf16>, vector<16x32xf32> -> vector<16x32xf32>
      %c0_67 = arith.constant 0 : index
      %116 = arith.index_cast %arg15 : i32 to index
      %c0_68 = arith.constant 0 : index
      %c0_69 = arith.constant 0 : index
      %117 = vector.load %arg6[%c0_67, %116, %c0_68, %c0_69] : memref<1x12x1x32xf32, #tpu.memory_space<vmem>>, vector<1x1x1x32xf32>
      %118 = vector.shape_cast %117 : vector<1x1x1x32xf32> to vector<1x32xf32>
      %119 = vector.broadcast %118 : vector<1x32xf32> to vector<16x32xf32>
      %120 = arith.addf %115, %119 : vector<16x32xf32>
      %121 = arith.truncf %120 : vector<16x32xf32> to vector<16x32xbf16>
      %122 = vector.extract_strided_slice %121 {offsets = [0, 0], sizes = [8, 32], strides = [1, 1]} : vector<16x32xbf16> to vector<8x32xbf16>
      %c0_i32_70 = arith.constant 0 : i32
      %123 = arith.addi %c0_i32_70, %arg15 : i32
      %124 = arith.index_cast %123 : i32 to index
      %c0_71 = arith.constant 0 : index
      %c0_72 = arith.constant 0 : index
      %125 = vector.load %arg13[%124, %c0_71, %c0_72] : memref<24x8x32xbf16, #tpu.memory_space<vmem>>, vector<1x8x32xbf16>
      %126 = vector.shape_cast %125 : vector<1x8x32xbf16> to vector<8x32xbf16>
      %127 = vector.shape_cast %122 : vector<8x32xbf16> to vector<1x8x32xbf16>
      tpu.vector_store %arg13[%124, %c0_71, %c0_72], %127 {strides = array<i32>} : memref<24x8x32xbf16, #tpu.memory_space<vmem>>, vector<1x8x32xbf16>,
      %128 = vector.extract_strided_slice %121 {offsets = [8, 0], sizes = [8, 32], strides = [1, 1]} : vector<16x32xbf16> to vector<8x32xbf16>
      %c12_i32_73 = arith.constant 12 : i32
      %129 = arith.addi %c12_i32_73, %arg15 : i32
      %130 = arith.index_cast %129 : i32 to index
      %c0_74 = arith.constant 0 : index
      %c0_75 = arith.constant 0 : index
      %131 = vector.load %arg13[%130, %c0_74, %c0_75] : memref<24x8x32xbf16, #tpu.memory_space<vmem>>, vector<1x8x32xbf16>
      %132 = vector.shape_cast %131 : vector<1x8x32xbf16> to vector<8x32xbf16>
      %133 = vector.shape_cast %128 : vector<8x32xbf16> to vector<1x8x32xbf16>
      tpu.vector_store %arg13[%130, %c0_74, %c0_75], %133 {strides = array<i32>} : memref<24x8x32xbf16, #tpu.memory_space<vmem>>, vector<1x8x32xbf16>,
    }
    %c12_i32_18 = arith.constant 12 : i32
    %c0_19 = arith.constant 0 : index
    %c0_20 = arith.constant 0 : index
    %c0_21 = arith.constant 0 : index
    %20 = vector.load %arg2[%c0_19, %c0_20, %c0_21] : memref<2x1x8xf32, #tpu.memory_space<vmem>>, vector<1x1x8xf32>
    %21 = vector.shape_cast %20 : vector<1x1x8xf32> to vector<1x8xf32>
    %22 = vector.shape_cast %21 : vector<1x8xf32> to vector<1x8xf32>
    %23 = vector.broadcast %22 : vector<1x8xf32> to vector<8x8xf32>
    %cst = arith.constant 0.000000e+00 : f32
    %24 = vector.broadcast %cst : f32 to vector<8x128xf32>
    %c0_i32_22 = arith.constant 0 : i32
    %c4_i32 = arith.constant 4 : i32
    %25 = arith.addi %c0_i32_22, %c4_i32 : i32
    %c1_i32_23 = arith.constant 1 : i32
    %26 = scf.for %arg15 = %c0_i32_22 to %25 step %c1_i32_23 iter_args(%arg16 = %24) -> (vector<8x128xf32>)  : i32 {
      %c0_i32_63 = arith.constant 0 : i32
      %112 = arith.addi %c0_i32_63, %arg15 : i32
      %113 = arith.index_cast %112 : i32 to index
      %c0_64 = arith.constant 0 : index
      %c0_65 = arith.constant 0 : index
      %114 = vector.load %arg13[%113, %c0_64, %c0_65] : memref<24x8x32xbf16, #tpu.memory_space<vmem>>, vector<1x8x32xbf16>
      %115 = vector.shape_cast %114 : vector<1x8x32xbf16> to vector<8x32xbf16>
      %c4_i32_66 = arith.constant 4 : i32
      %116 = arith.addi %c4_i32_66, %arg15 : i32
      %117 = arith.index_cast %116 : i32 to index
      %c0_67 = arith.constant 0 : index
      %c0_68 = arith.constant 0 : index
      %118 = vector.load %arg13[%117, %c0_67, %c0_68] : memref<24x8x32xbf16, #tpu.memory_space<vmem>>, vector<1x8x32xbf16>
      %119 = vector.shape_cast %118 : vector<1x8x32xbf16> to vector<8x32xbf16>
      %c8_i32 = arith.constant 8 : i32
      %120 = arith.addi %c8_i32, %arg15 : i32
      %121 = arith.index_cast %120 : i32 to index
      %c0_69 = arith.constant 0 : index
      %c0_70 = arith.constant 0 : index
      %122 = vector.load %arg13[%121, %c0_69, %c0_70] : memref<24x8x32xbf16, #tpu.memory_space<vmem>>, vector<1x8x32xbf16>
      %123 = vector.shape_cast %122 : vector<1x8x32xbf16> to vector<8x32xbf16>
      %cst_71 = arith.constant dense<0.000000e+00> : vector<8x8xf32>
      %124 = tpu.matmul %115, %119, %cst_71 {dimension_numbers = #tpu.dot_dimension_numbers<[1], [1], [0], [0], [0, 0, 1, 0], [], []>} : vector<8x32xbf16>, vector<8x32xbf16>, vector<8x8xf32> -> vector<8x8xf32>
      %125 = arith.addf %124, %23 : vector<8x8xf32>
      %cst_72 = arith.constant dense<0xFF800000> : vector<8xf32>
      %126 = vector.multi_reduction <maximumf>, %125, %cst_72 [1] : vector<8x8xf32> to vector<8xf32>
      %127 = vector.shape_cast %126 : vector<8xf32> to vector<8x1xf32>
      %128 = vector.broadcast %127 : vector<8x1xf32> to vector<8x8xf32>
      %129 = arith.subf %125, %128 : vector<8x8xf32>
      %130 = math.exp %129 : vector<8x8xf32>
      %cst_73 = arith.constant dense<0.000000e+00> : vector<8xf32>
      %131 = vector.multi_reduction <add>, %130, %cst_73 [1] : vector<8x8xf32> to vector<8xf32>
      %132 = vector.shape_cast %131 : vector<8xf32> to vector<8x1xf32>
      %133 = tpu.reciprocal %132 {approx = true} : vector<8x1xf32> -> vector<8x1xf32>
      %134 = vector.broadcast %133 : vector<8x1xf32> to vector<8x8xf32>
      %135 = arith.mulf %130, %134 : vector<8x8xf32>
      %136 = arith.truncf %135 : vector<8x8xf32> to vector<8x8xbf16>
      %cst_74 = arith.constant dense<0.000000e+00> : vector<8x32xf32>
      %137 = tpu.matmul %136, %123, %cst_74 {dimension_numbers = #tpu.dot_dimension_numbers<[1], [0], [0], [1], [0, 0, 1, 1], [], []>} : vector<8x8xbf16>, vector<8x32xbf16>, vector<8x32xf32> -> vector<8x32xf32>
      %138 = arith.truncf %137 : vector<8x32xf32> to vector<8x32xbf16>
      %c0_75 = arith.constant 0 : index
      %139 = arith.index_cast %arg15 : i32 to index
      %c0_76 = arith.constant 0 : index
      %c0_77 = arith.constant 0 : index
      %140 = vector.load %arg7[%c0_75, %139, %c0_76, %c0_77] : memref<1x4x32x128xbf16, #tpu.memory_space<vmem>>, vector<1x1x32x128xbf16>
      %141 = vector.shape_cast %140 : vector<1x1x32x128xbf16> to vector<32x128xbf16>
      %cst_78 = arith.constant dense<0.000000e+00> : vector<8x128xf32>
      %142 = tpu.matmul %138, %141, %cst_78 {dimension_numbers = #tpu.dot_dimension_numbers<[1], [0], [0], [1], [0, 0, 1, 1], [], []>} : vector<8x32xbf16>, vector<32x128xbf16>, vector<8x128xf32> -> vector<8x128xf32>
      %143 = arith.addf %arg16, %142 : vector<8x128xf32>
      scf.yield %143 : vector<8x128xf32>
    }
    %c4_i32_24 = arith.constant 4 : i32
    %c0_25 = arith.constant 0 : index
    %c0_26 = arith.constant 0 : index
    %27 = vector.load %arg14[%c0_25, %c0_26] : memref<16x128xf32, #tpu.memory_space<vmem>>, vector<8x128xf32>
    tpu.vector_store %arg14[%c0_25, %c0_26], %26 {strides = array<i32>} : memref<16x128xf32, #tpu.memory_space<vmem>>, vector<8x128xf32>,
    %c1 = arith.constant 1 : index
    %c0_27 = arith.constant 0 : index
    %c0_28 = arith.constant 0 : index
    %28 = vector.load %arg2[%c1, %c0_27, %c0_28] : memref<2x1x8xf32, #tpu.memory_space<vmem>>, vector<1x1x8xf32>
    %29 = vector.shape_cast %28 : vector<1x1x8xf32> to vector<1x8xf32>
    %30 = vector.shape_cast %29 : vector<1x8xf32> to vector<1x8xf32>
    %31 = vector.broadcast %30 : vector<1x8xf32> to vector<8x8xf32>
    %cst_29 = arith.constant 0.000000e+00 : f32
    %32 = vector.broadcast %cst_29 : f32 to vector<8x128xf32>
    %c0_i32_30 = arith.constant 0 : i32
    %c4_i32_31 = arith.constant 4 : i32
    %33 = arith.addi %c0_i32_30, %c4_i32_31 : i32
    %c1_i32_32 = arith.constant 1 : i32
    %34 = scf.for %arg15 = %c0_i32_30 to %33 step %c1_i32_32 iter_args(%arg16 = %32) -> (vector<8x128xf32>)  : i32 {
      %c12_i32_63 = arith.constant 12 : i32
      %112 = arith.addi %c12_i32_63, %arg15 : i32
      %113 = arith.index_cast %112 : i32 to index
      %c0_64 = arith.constant 0 : index
      %c0_65 = arith.constant 0 : index
      %114 = vector.load %arg13[%113, %c0_64, %c0_65] : memref<24x8x32xbf16, #tpu.memory_space<vmem>>, vector<1x8x32xbf16>
      %115 = vector.shape_cast %114 : vector<1x8x32xbf16> to vector<8x32xbf16>
      %c16_i32 = arith.constant 16 : i32
      %116 = arith.addi %c16_i32, %arg15 : i32
      %117 = arith.index_cast %116 : i32 to index
      %c0_66 = arith.constant 0 : index
      %c0_67 = arith.constant 0 : index
      %118 = vector.load %arg13[%117, %c0_66, %c0_67] : memref<24x8x32xbf16, #tpu.memory_space<vmem>>, vector<1x8x32xbf16>
      %119 = vector.shape_cast %118 : vector<1x8x32xbf16> to vector<8x32xbf16>
      %c20_i32 = arith.constant 20 : i32
      %120 = arith.addi %c20_i32, %arg15 : i32
      %121 = arith.index_cast %120 : i32 to index
      %c0_68 = arith.constant 0 : index
      %c0_69 = arith.constant 0 : index
      %122 = vector.load %arg13[%121, %c0_68, %c0_69] : memref<24x8x32xbf16, #tpu.memory_space<vmem>>, vector<1x8x32xbf16>
      %123 = vector.shape_cast %122 : vector<1x8x32xbf16> to vector<8x32xbf16>
      %cst_70 = arith.constant dense<0.000000e+00> : vector<8x8xf32>
      %124 = tpu.matmul %115, %119, %cst_70 {dimension_numbers = #tpu.dot_dimension_numbers<[1], [1], [0], [0], [0, 0, 1, 0], [], []>} : vector<8x32xbf16>, vector<8x32xbf16>, vector<8x8xf32> -> vector<8x8xf32>
      %125 = arith.addf %124, %31 : vector<8x8xf32>
      %cst_71 = arith.constant dense<0xFF800000> : vector<8xf32>
      %126 = vector.multi_reduction <maximumf>, %125, %cst_71 [1] : vector<8x8xf32> to vector<8xf32>
      %127 = vector.shape_cast %126 : vector<8xf32> to vector<8x1xf32>
      %128 = vector.broadcast %127 : vector<8x1xf32> to vector<8x8xf32>
      %129 = arith.subf %125, %128 : vector<8x8xf32>
      %130 = math.exp %129 : vector<8x8xf32>
      %cst_72 = arith.constant dense<0.000000e+00> : vector<8xf32>
      %131 = vector.multi_reduction <add>, %130, %cst_72 [1] : vector<8x8xf32> to vector<8xf32>
      %132 = vector.shape_cast %131 : vector<8xf32> to vector<8x1xf32>
      %133 = tpu.reciprocal %132 {approx = true} : vector<8x1xf32> -> vector<8x1xf32>
      %134 = vector.broadcast %133 : vector<8x1xf32> to vector<8x8xf32>
      %135 = arith.mulf %130, %134 : vector<8x8xf32>
      %136 = arith.truncf %135 : vector<8x8xf32> to vector<8x8xbf16>
      %cst_73 = arith.constant dense<0.000000e+00> : vector<8x32xf32>
      %137 = tpu.matmul %136, %123, %cst_73 {dimension_numbers = #tpu.dot_dimension_numbers<[1], [0], [0], [1], [0, 0, 1, 1], [], []>} : vector<8x8xbf16>, vector<8x32xbf16>, vector<8x32xf32> -> vector<8x32xf32>
      %138 = arith.truncf %137 : vector<8x32xf32> to vector<8x32xbf16>
      %c0_74 = arith.constant 0 : index
      %139 = arith.index_cast %arg15 : i32 to index
      %c0_75 = arith.constant 0 : index
      %c0_76 = arith.constant 0 : index
      %140 = vector.load %arg7[%c0_74, %139, %c0_75, %c0_76] : memref<1x4x32x128xbf16, #tpu.memory_space<vmem>>, vector<1x1x32x128xbf16>
      %141 = vector.shape_cast %140 : vector<1x1x32x128xbf16> to vector<32x128xbf16>
      %cst_77 = arith.constant dense<0.000000e+00> : vector<8x128xf32>
      %142 = tpu.matmul %138, %141, %cst_77 {dimension_numbers = #tpu.dot_dimension_numbers<[1], [0], [0], [1], [0, 0, 1, 1], [], []>} : vector<8x32xbf16>, vector<32x128xbf16>, vector<8x128xf32> -> vector<8x128xf32>
      %143 = arith.addf %arg16, %142 : vector<8x128xf32>
      scf.yield %143 : vector<8x128xf32>
    }
    %c4_i32_33 = arith.constant 4 : i32
    %c8 = arith.constant 8 : index
    %c0_34 = arith.constant 0 : index
    %35 = vector.load %arg14[%c8, %c0_34] : memref<16x128xf32, #tpu.memory_space<vmem>>, vector<8x128xf32>
    tpu.vector_store %arg14[%c8, %c0_34], %34 {strides = array<i32>} : memref<16x128xf32, #tpu.memory_space<vmem>>, vector<8x128xf32>,
    %c0_35 = arith.constant 0 : index
    %c0_36 = arith.constant 0 : index
    %36 = vector.load %arg14[%c0_35, %c0_36] : memref<16x128xf32, #tpu.memory_space<vmem>>, vector<16x128xf32>
    %37 = vector.broadcast %4 : vector<1x128xf32> to vector<16x128xf32>
    %38 = arith.addf %36, %37 : vector<16x128xf32>
    %39 = arith.addf %38, %17 : vector<16x128xf32>
    %cst_37 = arith.constant dense<0.000000e+00> : vector<16xf32>
    %40 = vector.multi_reduction <add>, %39, %cst_37 [1] : vector<16x128xf32> to vector<16xf32>
    %41 = vector.shape_cast %40 : vector<16xf32> to vector<16x1xf32>
    %cst_38 = arith.constant 1.280000e+02 : f32
    %42 = vector.broadcast %cst_38 : f32 to vector<16x1xf32>
    %43 = arith.divf %41, %42 : vector<16x1xf32>
    %44 = vector.broadcast %43 : vector<16x1xf32> to vector<16x128xf32>
    %45 = arith.subf %39, %44 : vector<16x128xf32>
    %46 = arith.mulf %45, %45 : vector<16x128xf32>
    %cst_39 = arith.constant dense<0.000000e+00> : vector<16xf32>
    %47 = vector.multi_reduction <add>, %46, %cst_39 [1] : vector<16x128xf32> to vector<16xf32>
    %48 = vector.shape_cast %47 : vector<16xf32> to vector<16x1xf32>
    %cst_40 = arith.constant 1.280000e+02 : f32
    %49 = vector.broadcast %cst_40 : f32 to vector<16x1xf32>
    %50 = arith.divf %48, %49 : vector<16x1xf32>
    %cst_41 = arith.constant 9.99999996E-13 : f32
    %51 = vector.broadcast %cst_41 : f32 to vector<16x1xf32>
    %52 = arith.addf %50, %51 : vector<16x1xf32>
    %53 = math.rsqrt %52 : vector<16x1xf32>
    %54 = vector.broadcast %53 : vector<16x1xf32> to vector<16x128xf32>
    %55 = arith.mulf %45, %54 : vector<16x128xf32>
    %56 = vector.broadcast %6 : vector<1x128xf32> to vector<16x128xf32>
    %57 = arith.mulf %55, %56 : vector<16x128xf32>
    %58 = vector.broadcast %8 : vector<1x128xf32> to vector<16x128xf32>
    %59 = arith.addf %57, %58 : vector<16x128xf32>
    %60 = arith.truncf %59 : vector<16x128xf32> to vector<16x128xbf16>
    %c0_42 = arith.constant 0 : index
    %c0_43 = arith.constant 0 : index
    %c0_44 = arith.constant 0 : index
    %61 = vector.load %arg8[%c0_42, %c0_43, %c0_44] : memref<1x128x256xbf16, #tpu.memory_space<vmem>>, vector<1x128x256xbf16>
    %62 = vector.shape_cast %61 : vector<1x128x256xbf16> to vector<128x256xbf16>
    %cst_45 = arith.constant dense<0.000000e+00> : vector<16x256xf32>
    %63 = tpu.matmul %60, %62, %cst_45 {dimension_numbers = #tpu.dot_dimension_numbers<[1], [0], [0], [1], [0, 0, 1, 1], [], []>} : vector<16x128xbf16>, vector<128x256xbf16>, vector<16x256xf32> -> vector<16x256xf32>
    %64 = vector.broadcast %10 : vector<1x256xf32> to vector<16x256xf32>
    %65 = arith.addf %63, %64 : vector<16x256xf32>
    %cst_46 = arith.constant 5.000000e-01 : f32
    %66 = vector.broadcast %cst_46 : f32 to vector<16x256xf32>
    %67 = arith.mulf %66, %65 : vector<16x256xf32>
    %cst_47 = arith.constant 4.471500e-02 : f32
    %68 = vector.broadcast %cst_47 : f32 to vector<16x256xf32>
    %69 = arith.mulf %68, %65 : vector<16x256xf32>
    %70 = arith.mulf %69, %65 : vector<16x256xf32>
    %71 = arith.mulf %70, %65 : vector<16x256xf32>
    %72 = arith.addf %65, %71 : vector<16x256xf32>
    %cst_48 = arith.constant 0.797884583 : f32
    %73 = vector.broadcast %cst_48 : f32 to vector<16x256xf32>
    %74 = arith.mulf %73, %72 : vector<16x256xf32>
    %75 = math.tanh %74 : vector<16x256xf32>
    %cst_49 = arith.constant 1.000000e+00 : f32
    %76 = vector.broadcast %cst_49 : f32 to vector<16x256xf32>
    %77 = arith.addf %76, %75 : vector<16x256xf32>
    %78 = arith.mulf %67, %77 : vector<16x256xf32>
    %79 = arith.truncf %78 : vector<16x256xf32> to vector<16x256xbf16>
    %c0_50 = arith.constant 0 : index
    %c0_51 = arith.constant 0 : index
    %c0_52 = arith.constant 0 : index
    %80 = vector.load %arg9[%c0_50, %c0_51, %c0_52] : memref<1x256x128xbf16, #tpu.memory_space<vmem>>, vector<1x256x128xbf16>
    %81 = vector.shape_cast %80 : vector<1x256x128xbf16> to vector<256x128xbf16>
    %cst_53 = arith.constant dense<0.000000e+00> : vector<16x128xf32>
    %82 = tpu.matmul %79, %81, %cst_53 {dimension_numbers = #tpu.dot_dimension_numbers<[1], [0], [0], [1], [0, 0, 1, 1], [], []>} : vector<16x256xbf16>, vector<256x128xbf16>, vector<16x128xf32> -> vector<16x128xf32>
    %83 = vector.broadcast %12 : vector<1x128xf32> to vector<16x128xf32>
    %84 = arith.addf %82, %83 : vector<16x128xf32>
    %85 = arith.addf %84, %59 : vector<16x128xf32>
    %cst_54 = arith.constant dense<0.000000e+00> : vector<16xf32>
    %86 = vector.multi_reduction <add>, %85, %cst_54 [1] : vector<16x128xf32> to vector<16xf32>
    %87 = vector.shape_cast %86 : vector<16xf32> to vector<16x1xf32>
    %cst_55 = arith.constant 1.280000e+02 : f32
    %88 = vector.broadcast %cst_55 : f32 to vector<16x1xf32>
    %89 = arith.divf %87, %88 : vector<16x1xf32>
    %90 = vector.broadcast %89 : vector<16x1xf32> to vector<16x128xf32>
    %91 = arith.subf %85, %90 : vector<16x128xf32>
    %92 = arith.mulf %91, %91 : vector<16x128xf32>
    %cst_56 = arith.constant dense<0.000000e+00> : vector<16xf32>
    %93 = vector.multi_reduction <add>, %92, %cst_56 [1] : vector<16x128xf32> to vector<16xf32>
    %94 = vector.shape_cast %93 : vector<16xf32> to vector<16x1xf32>
    %cst_57 = arith.constant 1.280000e+02 : f32
    %95 = vector.broadcast %cst_57 : f32 to vector<16x1xf32>
    %96 = arith.divf %94, %95 : vector<16x1xf32>
    %cst_58 = arith.constant 9.99999996E-13 : f32
    %97 = vector.broadcast %cst_58 : f32 to vector<16x1xf32>
    %98 = arith.addf %96, %97 : vector<16x1xf32>
    %99 = math.rsqrt %98 : vector<16x1xf32>
    %100 = vector.broadcast %99 : vector<16x1xf32> to vector<16x128xf32>
    %101 = arith.mulf %91, %100 : vector<16x128xf32>
    %102 = vector.broadcast %14 : vector<1x128xf32> to vector<16x128xf32>
    %103 = arith.mulf %101, %102 : vector<16x128xf32>
    %104 = vector.broadcast %16 : vector<1x128xf32> to vector<16x128xf32>
    %105 = arith.addf %103, %104 : vector<16x128xf32>
    %c1_i32_59 = arith.constant 1 : i32
    %106 = arith.cmpi slt, %arg0, %c1_i32_59 : i32
    %107 = arith.extui %106 : i1 to i32
    %c0_i32_60 = arith.constant 0 : i32
    %108 = arith.cmpi ne, %107, %c0_i32_60 : i32
    scf.if %108 {
      %c0_63 = arith.constant 0 : index
      %c0_64 = arith.constant 0 : index
      %112 = vector.load %arg12[%c0_63, %c0_64] : memref<16x128xf32, #tpu.memory_space<vmem>>, vector<16x128xf32>
      tpu.vector_store %arg12[%c0_63, %c0_64], %105 {strides = array<i32>} : memref<16x128xf32, #tpu.memory_space<vmem>>, vector<16x128xf32>,
    } else {
    }
    %c1_i32_61 = arith.constant 1 : i32
    %109 = arith.cmpi eq, %arg0, %c1_i32_61 : i32
    %110 = arith.extui %109 : i1 to i32
    %c0_i32_62 = arith.constant 0 : i32
    %111 = arith.cmpi ne, %110, %c0_i32_62 : i32
    scf.if %111 {
      %c0_63 = arith.constant 0 : index
      %c0_64 = arith.constant 0 : index
      %112 = vector.load %arg11[%c0_63, %c0_64] : memref<16x128xf32, #tpu.memory_space<vmem>>, vector<16x128xf32>
      tpu.vector_store %arg11[%c0_63, %c0_64], %105 {strides = array<i32>} : memref<16x128xf32, #tpu.memory_space<vmem>>, vector<16x128xf32>,
    } else {
    }
    return
  }
  func.func @transform_0(%arg0: i32) -> (i32, i32) {
    %c0_i32 = arith.constant 0 : i32
    %c0_i32_0 = arith.constant 0 : i32
    %c0_i32_1 = arith.constant 0 : i32
    return %c0_i32, %c0_i32_0 : i32, i32
  }
  func.func @transform_1(%arg0: i32) -> (i32, i32, i32) {
    %c0_i32 = arith.constant 0 : i32
    %c0_i32_0 = arith.constant 0 : i32
    %c0_i32_1 = arith.constant 0 : i32
    %c0_i32_2 = arith.constant 0 : i32
    return %c0_i32, %c0_i32_0, %c0_i32_1 : i32, i32, i32
  }
  func.func @transform_2(%arg0: i32) -> (i32, i32) {
    %c0_i32 = arith.constant 0 : i32
    %c0_i32_0 = arith.constant 0 : i32
    %c0_i32_1 = arith.constant 0 : i32
    return %c0_i32, %c0_i32_0 : i32, i32
  }
  func.func @transform_3(%arg0: i32) -> (i32, i32) {
    %c0_i32 = arith.constant 0 : i32
    %c0_i32_0 = arith.constant 0 : i32
    %c0_i32_1 = arith.constant 0 : i32
    return %c0_i32, %c0_i32_0 : i32, i32
  }
  func.func @transform_4(%arg0: i32) -> (i32, i32, i32, i32) {
    %c0_i32 = arith.constant 0 : i32
    %c0_i32_0 = arith.constant 0 : i32
    %c0_i32_1 = arith.constant 0 : i32
    %c0_i32_2 = arith.constant 0 : i32
    return %arg0, %c0_i32, %c0_i32_0, %c0_i32_1 : i32, i32, i32, i32
  }
  func.func @transform_5(%arg0: i32) -> (i32, i32, i32, i32) {
    %c0_i32 = arith.constant 0 : i32
    %c0_i32_0 = arith.constant 0 : i32
    %c0_i32_1 = arith.constant 0 : i32
    %c0_i32_2 = arith.constant 0 : i32
    return %arg0, %c0_i32, %c0_i32_0, %c0_i32_1 : i32, i32, i32, i32
  }
  func.func @transform_6(%arg0: i32) -> (i32, i32, i32, i32) {
    %c0_i32 = arith.constant 0 : i32
    %c0_i32_0 = arith.constant 0 : i32
    %c0_i32_1 = arith.constant 0 : i32
    %c0_i32_2 = arith.constant 0 : i32
    return %arg0, %c0_i32, %c0_i32_0, %c0_i32_1 : i32, i32, i32, i32
  }
  func.func @transform_7(%arg0: i32) -> (i32, i32, i32) {
    %c0_i32 = arith.constant 0 : i32
    %c0_i32_0 = arith.constant 0 : i32
    %c0_i32_1 = arith.constant 0 : i32
    return %arg0, %c0_i32, %c0_i32_0 : i32, i32, i32
  }
  func.func @transform_8(%arg0: i32) -> (i32, i32, i32) {
    %c0_i32 = arith.constant 0 : i32
    %c0_i32_0 = arith.constant 0 : i32
    %c0_i32_1 = arith.constant 0 : i32
    return %arg0, %c0_i32, %c0_i32_0 : i32, i32, i32
  }
  func.func @transform_9(%arg0: i32) -> (i32, i32, i32) {
    %c0_i32 = arith.constant 0 : i32
    %c0_i32_0 = arith.constant 0 : i32
    %c0_i32_1 = arith.constant 0 : i32
    return %arg0, %c0_i32, %c0_i32_0 : i32, i32, i32
  }
  func.func @transform_10(%arg0: i32) -> (i32, i32) {
    %c0_i32 = arith.constant 0 : i32
    %c0_i32_0 = arith.constant 0 : i32
    %c0_i32_1 = arith.constant 0 : i32
    return %c0_i32, %c0_i32_0 : i32, i32
  }
}

</mosaic_0001>

<bundles_post_ra>
// kernel: bert_encoder_forward.1
= control target key start
LH: loop header
LB: loop body
LE: loop exit
PB: predicated region body
PF: predicated region fallthrough
CT: control target
= control target key end

     0   :  { %15 = vsyncpa [#allocation6], 0  ;;  %s1975_s13 = smov 0   ;;  %s2207_s0 = inlined_call_operand.vmem [shape: f32[16,128], index: 0, kind: input, shape index: {}]   ;;  %s2208_s1 = inlined_call_operand.vmem [shape: f32[2,1,8], index: 1, kind: input, shape index: {}]   ;;  %s2209_s2 = inlined_call_operand.vmem [shape: f32[1,128], index: 2, kind: input, shape index: {}]   ;;  %s2210_s3 = inlined_call_operand.vmem [shape: f32[1,128], index: 3, kind: input, shape index: {}]   ;;  %s2211_s4 = inlined_call_operand.vmem [shape: bf16[2,12,128,32], index: 4, kind: input, shape index: {}]   ;;  %s2212_s5 = inlined_call_operand.vmem [shape: f32[2,12,1,32], index: 5, kind: input, shape index: {}]   ;;  %s2213_s6 = inlined_call_operand.vmem [shape: bf16[2,4,32,128], index: 6, kind: input, shape index: {}]   ;;  %s2214_s7 = inlined_call_operand.vmem [shape: bf16[2,128,256], index: 7, kind: input, shape index: {}]   ;;  %s2215_s8 = inlined_call_operand.vmem [shape: bf16[2,256,128], index: 8, kind: input, shape index: {}]   ;;  %s2216_s9 = inlined_call_operand.vmem [shape: f32[2,1,1024], index: 9, kind: input, shape index: {}]   ;;  %s2217_s10 = inlined_call_operand.hbm [shape: f32[16,128], index: 10, kind: output, shape index: {}]  }
   0x1 LB: > { %s1981_s14 = sadd.s32 4294967295, %s1893_s13   ;;  %p1468_p0 = scmp.ge.s32.totalorder %s1893_s13, 1  ;;  %s1893_s13 = sphi %s1975_s13, %s21_s13  }
   0x2   : > { %p356_p1 = scmp.lt.s32.totalorder %s1893_s13, 3 }
   0x4   : > { %p357_p2 = pnand %p1468_p0, %p356_p1 }
   0x5   : > { %p412_p3 = scmp.lt.s32.totalorder (!%p357_p2), %s1981_s14, 1  ;;  %p1477_p4 = scmp.ne.s32.totalorder (!%p357_p2), %s1981_s14, 0 }
   0x6   : > { %360 = sbr.rel (%p357_p2) target bundleno = 2663 (0xa67), region = 60 }
   0xb   : > { %s413_s15 = scalar_select %p412_p3, %s1981_s14, 1 }
   0xd   : > { %s1737_s16 = smul.u32 768, %s413_s15  ;;  %s1687_s17 = sshll.u32 %s413_s15, 6 }
   0xe   : > { %s1738_s18 = smul.u32 12, %s413_s15  ;;  %s1990_s21 = scalar_lea.vmem %s2213_s6, %s1687_s17 }
   0xf   : > { %s1995_s24 = scalar_lea.vmem %s2211_s4, %s1737_s16  ;;  %s1688_s25 = sshll.u32 %s413_s15, 7 }
  0x10   : > { %s2000_s28 = scalar_lea.vmem %s2212_s5, %s1738_s18  ;;  %s2005_s11 = scalar_lea.vmem %s2214_s7, %s1688_s25 }
  0x11   : > { %s2010_s17 = scalar_lea.vmem %s2215_s8, %s1688_s25  ;;  %s1476_s20 = sshll.u32 %s413_s15, 3 }
  0x12   : > { %s2015_s23 = scalar_lea.vmem %s2216_s9, %s1476_s20  ;;  %444 = sbr.rel (%p1477_p4) target bundleno = 299 (0x12b), region = 64 }
  0x17   : > { %v445_v0 = vld [vmem:[%s2207_s0] sm:$0xff]  ;;  %v446_v1 = vld [vmem:[%s2207_s0 + $0x8] sm:$0xff]  ;;  %v1915_v2 = vmov 128.0  }
  0x18   : > { %449 = vadd.xlane.f32.xlu0 %v445_v0  ;;  %1800 = vrcp.f32 %v1915_v2  ;;  %v1798_v31 = vld [vmem:[%s2209_s2] ss:$0 sm:$0xff] }
  0x19   : > { %v1799_v34 = vld [vmem:[%s2210_s3] ss:$0 sm:$0xff] }
  0x1e   : > { %v1801_v3 = vpop.eup %1800 }
  0x1f   : > { %v454_v4 = vmul.f32 128.0, %v1801_v3  ;;  %vm458_vm0 = vweird.f32 %v1801_v3 }
  0x20   : > { %451 = vadd.xlane.f32.xlu0 %v446_v1 }
  0x21   : > { %v455_v5 = vsub.f32 1.0, %v454_v4 }
  0x23   : > { %v456_v6 = vmul.f32 %v1801_v3, %v455_v5 }
  0x25   : > { %v457_v7 = vadd.f32 %v1801_v3, %v456_v6 }
  0x27   : > { %v459_v8 = vsel %vm458_vm0, %v1801_v3, %v457_v7 }
  0x8b   : > { %v450_v9 = vpop.xlane.xlu0 %449 }
  0x8c   : > { %v460_v10 = vmul.f32 %v459_v8, %v450_v9 }
  0x8e   : > { %v462_v11 = vsub.f32 %v445_v0, %v460_v10 }
  0x90   : > { %v464_v12 = vmul.f32 %v462_v11, %v462_v11 }
  0x92   : > { %466 = vadd.xlane.f32.xlu1 %v464_v12 }
  0x93   : > { %v452_v13 = vpop.xlane.xlu0 %451 }
  0x94   : > { %v461_v14 = vmul.f32 %v459_v8, %v452_v13 }
  0x96   : > { %v463_v15 = vsub.f32 %v446_v1, %v461_v14 }
  0x98   : > { %v465_v16 = vmul.f32 %v463_v15, %v463_v15 }
  0x9a   : > { %468 = vadd.xlane.f32.xlu1 %v465_v16 }
 0x105   : > { %v467_v17 = vpop.xlane.xlu1 %466 }
 0x106   : > { %v470_v18 = vmul.f32 %v467_v17, %v459_v8 }
 0x108   : > { %v472_v19 = vadd.f32 1e-12, %v470_v18 }
 0x10a   : > { %1802 = vrsqrt.f32 %v472_v19  ;;  %vm480_vm2 = vweird.f32 %v472_v19 }
 0x10d   : > { %v469_v20 = vpop.xlane.xlu1 %468 }
 0x10e   : > { %v471_v21 = vmul.f32 %v469_v20, %v459_v8 }
 0x110   : > { %v1803_v22 = vpop.eup %1802  ;;  %v473_v23 = vadd.f32 1e-12, %v471_v21 }
 0x111   : > { %v475_v24 = vmul.f32 %v1803_v22, %v472_v19  ;;  %vm481_vm1 = vweird.f32 %v1803_v22 }
 0x112   : > { %1804 = vrsqrt.f32 %v473_v23  ;;  %vm482_vm3 = vmor %vm480_vm2, %vm481_vm1  ;;  %vm490_vm5 = vweird.f32 %v473_v23 }
 0x113   : > { %v476_v25 = vmul.f32 %v1803_v22, %v475_v24 }
 0x115   : > { %v477_v26 = vmul.f32 0.5, %v476_v25 }
 0x117   : > { %v478_v27 = vsub.f32 1.5, %v477_v26 }
 0x118   : > { %v1805_v28 = vpop.eup %1804 }
 0x119   : > { %v479_v29 = vmul.f32 %v1803_v22, %v478_v27  ;;  %v485_v30 = vmul.f32 %v1805_v28, %v473_v23  ;;  %vm491_vm4 = vweird.f32 %v1805_v28 }
 0x11a   : > { %vm492_vm6 = vmor %vm490_vm5, %vm491_vm4 }
 0x11b   : > { %v483_v32 = vsel %vm482_vm3, %v1803_v22, %v479_v29  ;;  %v486_v33 = vmul.f32 %v1805_v28, %v485_v30 }
 0x11c   : > { %v494_v35 = vmul.f32 %v483_v32, %v462_v11 }
 0x11d   : > { %v487_v36 = vmul.f32 0.5, %v486_v33 }
 0x11e   : > { %v499_v37 = vmul.f32 %v1798_v31, %v494_v35 }
 0x11f   : > { %v488_v38 = vsub.f32 1.5, %v487_v36 }
 0x120   : > { %v504_v39 = vadd.f32 %v1799_v34, %v499_v37 }
 0x121   : > { %v489_v40 = vmul.f32 %v1805_v28, %v488_v38 }
 0x122   : > { %506 = vst [vmem:[#allocation2] sm:$0xff] %v504_v39 }
 0x123   : > { %v493_v41 = vsel %vm492_vm6, %v1805_v28, %v489_v40 }
 0x124   : > { %v495_v42 = vmul.f32 %v493_v41, %v463_v15 }
 0x126   : > { %v500_v43 = vmul.f32 %v1798_v31, %v495_v42 }
 0x128   : > { %v505_v44 = vadd.f32 %v1799_v34, %v500_v43 }
 0x12a   : > { %507 = vst [vmem:[#allocation2 + $0x8] sm:$0xff] %v505_v44 }
 0x12b PF: > { %v2031_v45 = vld [vmem:[%s2015_s23] sm:$0x1]  ;;  %v2034_v46 = vld [vmem:[%s2015_s23 + $0x1] sm:$0x1]  ;;  %v2037_v47 = vld [vmem:[%s2015_s23 + $0x2] sm:$0x1] }
 0x12c   : > { %v2040_v48 = vld [vmem:[%s2015_s23 + $0x3] sm:$0x3]  ;;  %v2043_v49 = vld [vmem:[%s2015_s23 + $0x5] sm:$0x1]  ;;  %v2046_v50 = vld [vmem:[%s2015_s23 + $0x6] sm:$0x1] }
 0x12d   : > { %v2049_v51 = vld [vmem:[%s2015_s23 + $0x7] sm:$0x1]  ;;  %s2057_s19 = smov 0  }
 0x12e   : > { %v2051_v52 = vld [vmem:[#allocation2] sm:$0xff] }
 0x131   : > { %v2053_v53 = vld [vmem:[#allocation2 + $0x8] sm:$0xff] }
 0x132   : > { %v517_v54 = vpack.c.bf16 %v2053_v53, %v2051_v52 }
 0x133 LB: >> { %s1690_s20 = sshll.u32 %s1897_s19, 6  ;;  %s543_s22 = scalar_lea.vmem %s2000_s28, %s1897_s19  ;;  %vm614_vm7 = vcmask 257024   ;;  %s1897_s19 = sphi %s2057_s19, %s523_s19  }
 0x134   : >> { %s526_s16 = scalar_lea.vmem %s1995_s24, %s1690_s20  ;;  %v1806_v63 = vld [vmem:[%s543_s22] ss:$0 sm:$0xff]  ;;  %s1512_s23 = sshll.u32 %s1897_s19, 2 }
 0x135   : >> { %v1698_v55 = vld [vmem:[%s526_s16 + $0x38] sm:$0xff]  ;;  %v1697_v56 = vld [vmem:[%s526_s16 + $0x30] sm:$0xff]  ;;  %v1696_v57 = vld [vmem:[%s526_s16 + $0x28] sm:$0xff]  ;;  %s613_s18 = scalar_lea.vmem [#allocation3], %s1512_s23  ;;  %s523_s19 = sadd.s32 1, %s1897_s19  }
 0x136   : >> { %596 = vmatpush.bf16.msra.mxu0 %v1698_v55  ;;  %v1695_v58 = vld [vmem:[%s526_s16 + $0x20] sm:$0xff]  ;;  %v1694_v59 = vld [vmem:[%s526_s16 + $0x18] sm:$0xff]  ;;  %v1693_v60 = vld [vmem:[%s526_s16 + $0x10] sm:$0xff]  ;;  %p520_p5 = scmp.ge.s32.totalorder %s523_s19, 12  }
 0x137   : >> { %v1692_v61 = vld [vmem:[%s526_s16 + $0x8] sm:$0xff]  ;;  %v1691_v62 = vld [vmem:[%s526_s16] sm:$0xff]  ;;  %v1899_v7 = vmov (%p520_p5), 0.0   ;;  %s2073_s29 = smov (%p520_p5), 0  }
 0x138   : > { %v1807_v6 = vld [vmem:[%s2208_s1] ss:$0 sm:$0xff] (%p520_p5) }
 0x13a   : >> { %597 = vmatpush.bf16.msra.mxu0 %v1697_v56 }
 0x13e   : >> { %598 = vmatpush.bf16.msra.mxu0 %v1696_v57 }
 0x142   : >> { %599 = vmatpush.bf16.msra.mxu0 %v1695_v58 }
 0x146   : >> { %600 = vmatpush.bf16.msra.mxu0 %v1694_v59 }
 0x14a   : >> { %601 = vmatpush.bf16.msra.mxu0 %v1693_v60 }
 0x14e   : >> { %602 = vmatpush.bf16.msra.mxu0 %v1692_v61 }
 0x152   : >> { %603 = vmatpush.bf16.msra.mxu0 %v1691_v62 }
 0x155   : >> { %604 = vmatmul.bf16.vlgmr.msra.gmra.mxu0 %v517_v54 }
 0x1d2   : >> { %v605_v0 = vpop.f32.mrf.mxu0 }
 0x1d3   : >> { %v606_v1 = vadd.f32 %v1806_v63, %v605_v0 }
 0x1d5   : >> { %v610_v2 = vpack.c.bf16 %v606_v1, %v606_v1 }
 0x1d7   : >> { %615 = vst.msk [vmem:[%s613_s18] sm:$0xf] %vm614_vm7, %v610_v2 }
 0x1da   : >> { %v607_v3 = vpop.f32.mrf.mxu0 }
 0x1db   : >> { %v608_v4 = vadd.f32 %v1806_v63, %v607_v3  ;;  %522 = sbr.rel (!%p520_p5) target bundleno = 307 (0x133), region = 148 }
 0x1dd   : >> { %v611_v5 = vpack.c.bf16 %v608_v4, %v608_v4 }
 0x1df   : >> { %1514 = vst.msk [vmem:[%s613_s18 + $0x30] sm:$0xf] %vm614_vm7, %v611_v5 }
 0x1e0 LB: >> { %s1515_s15 = sshll.u32 %s1905_s29, 2  ;;  %vm642_vm8 = vcmask 261120   ;;  %vm662_vm9 = vcmask 64512   ;;  %vm678_vm10 = vcmask 1043456   ;;  %s1699_s24 = sshll.u32 %s1905_s29, 4  ;;  %s1905_s29 = sphi %s2073_s29, %s629_s29   ;;  %v1901_v7 = vphi %v1899_v7, %v1900_v7  }
 0x1e1   : >> { %s632_s25 = scalar_lea.vmem [#allocation3], %s1515_s15  ;;  %s698_s28 = scalar_lea.vmem %s1990_s21, %s1699_s24 }
 0x1e2   : >> { %v1701_v22 = vld [vmem:[%s698_s28 + $0x8] sm:$0xff]  ;;  %v1700_v27 = vld [vmem:[%s698_s28] sm:$0xff]  ;;  %s629_s29 = sadd.s32 1, %s1905_s29  }
 0x1e3   : >> { %724 = vmatpush.bf16.msra.mxu2 %v1701_v22  ;;  %p626_p6 = scmp.ge.s32.totalorder %s629_s29, 4  }
 0x1e4   : > { %v1812_v34 = vld [vmem:[%s2208_s1 + $0x1] ss:$0 sm:$0xff] (%p626_p6)  ;;  %v1907_v35 = vmov (%p626_p6), 0.0   ;;  %s2094_s19 = smov (%p626_p6), 0  }
 0x1e6   : >> { %v1517_v8 = vld [vmem:[%s632_s25 + $0x10] sm:$0xf]  ;;  %v633_v10 = vld [vmem:[%s632_s25] sm:$0xf] }
 0x1e7   : >> { %v647_v9 = vsel %vm642_vm8, %v1517_v8, 0  ;;  %v1519_v20 = vld [vmem:[%s632_s25 + $0x20] sm:$0xf]  ;;  %725 = vmatpush.bf16.msra.mxu2 %v1700_v27 }
 0x1e8   : >> { %656 = vmatpush.bf16.xpose.msra.mxu0 %v647_v9  ;;  %v680_v21 = vsel %vm678_vm10, %v1519_v20, 0 }
 0x1e9   : >> { %689 = vmatpush.bf16.msra.mxu1 %v680_v21 }
 0x1ef   : >> { %1520 = vmatmul.msk.bf16.vlgmr.msra.gmra.mxu0 %vm642_vm8, %v633_v10 }
 0x26c   : >> { %v658_v11 = vpop.f32.mrf.mxu0 }
 0x26d   : >> { %v659_v12 = vadd.f32 %v1807_v6, %v658_v11 }
 0x26f   : >> { %v663_v13 = vsel %vm662_vm9, %v659_v12, -inf }
 0x270   : >> { %664 = vmax.xlane.f32.xlu0 %v663_v13 }
 0x274   : >> { %v660_v14 = vpop.f32.mrf.mxu0 }
 0x2e3   : >> { %v665_v15 = vpop.xlane.xlu0 %664 }
 0x2e4   : >> { %v666_v16 = vsub.f32 %v659_v12, %v665_v15 }
 0x2e6   : >> { %v667_v17 = vmul.f32 1.442695, %v666_v16 }
 0x2e8   : >> { %1808 = vpow2.f32 %v667_v17 }
 0x2ee   : >> { %v1809_v18 = vpop.eup %1808 }
 0x2ef   : >> { %v669_v19 = vsel %vm662_vm9, %v1809_v18, 0.0 }
 0x2f0   : >> { %670 = vadd.xlane.f32.xlu0 %v669_v19 }
 0x363   : >> { %v671_v23 = vpop.xlane.xlu0 %670 }
 0x364   : >> { %1810 = vrcp.f32 %v671_v23 }
 0x36a   : >> { %v1811_v24 = vpop.eup %1810 }
 0x36b   : >> { %v673_v25 = vmul.f32 %v1811_v24, %v1809_v18 }
 0x36d   : >> { %v674_v26 = vpack.c.bf16 %v673_v25, %v673_v25 }
 0x36f   : >> { %1521 = vmatmul.msk.bf16.vlgmr.msra.gmra.mxu1 %vm662_vm9, %v674_v26 }
 0x3ec   : >> { %v691_v28 = vpop.f32.mrf.mxu1 }
 0x3ed   : >> { %v695_v29 = vpack.c.bf16 %v691_v28, %v691_v28 }
 0x3ef   : >> { %1532 = vmatmul.msk.bf16.vlgmr.msra.gmra.mxu2 %vm642_vm8, %v695_v29 }
 0x3f4   : >> { %v693_v30 = vpop.f32.mrf.mxu1 }
 0x472   : >> { %v727_v31 = vpop.f32.mrf.mxu2 }
 0x473   : >> { %v731_v32 = vadd.f32 %v1901_v7, %v727_v31  }
 0x475   : >> { %v1900_v7 = vmov %v731_v32   ;;  %732 = vst [vmem:[#allocation4 + $0x8] sm:$0xff] (%p626_p6), %v731_v32 }
 0x476   : > { %628 = sbr.rel (!%p626_p6) target bundleno = 480 (0x1e0), region = 159 }
 0x47a   : >> { %v729_v33 = vpop.f32.mrf.mxu2 }
 0x47b LB: >> { %s1534_s20 = sshll.u32 %s1913_s19, 2  ;;  %s1702_s16 = sshll.u32 %s1913_s19, 4  ;;  %s1913_s19 = sphi %s2094_s19, %s743_s19   ;;  %v1909_v35 = vphi %v1907_v35, %v1908_v35  }
 0x47c   : >> { %s1387_s22 = scalar_lea.vmem [#allocation3], %s1534_s20  ;;  %s813_s23 = scalar_lea.vmem %s1990_s21, %s1702_s16 }
 0x47d   : >> { %v1537_v36 = vld [vmem:[%s1387_s22 + $0x40] sm:$0xf]  ;;  %v1535_v38 = vld [vmem:[%s1387_s22 + $0x30] sm:$0xf]  ;;  %v1704_v59 = vld [vmem:[%s813_s23 + $0x8] sm:$0xff]  ;;  %s743_s19 = sadd.s32 1, %s1913_s19  }
 0x47e   : >> { %v762_v37 = vsel %vm642_vm8, %v1537_v36, 0  ;;  %v1539_v57 = vld [vmem:[%s1387_s22 + $0x50] sm:$0xf]  ;;  %839 = vmatpush.bf16.msra.mxu2 %v1704_v59  ;;  %v1703_v0 = vld [vmem:[%s813_s23] sm:$0xff]  ;;  %p740_p7 = scmp.ge.s32.totalorder %s743_s19, 4  }
 0x47f   : >> { %771 = vmatpush.bf16.xpose.msra.mxu0 %v762_v37  ;;  %v795_v58 = vsel %vm678_vm10, %v1539_v57, 0  ;;  %v848_v7 = vld [vmem:[#allocation4 + $0x8] sm:$0xff] (%p740_p7)  ;;  %v851_v8 = vperm.slane (%p740_p7), %v2031_v45, 0  ;;  %v1916_v13 = vmov (%p740_p7), 128.0   ;;  %v1611_v25 = vld [vmem:[%s2005_s11 + $0x70] sm:$0xf] (%p740_p7) }
 0x480   : >> { %804 = vmatpush.bf16.msra.mxu1 %v795_v58  ;;  %v1720_v26 = vld [vmem:[%s2005_s11 + $0x74] sm:$0xf0] (%p740_p7)  ;;  %v1719_v27 = vld [vmem:[%s2005_s11 + $0x74] sm:$0xf] (%p740_p7)  ;;  %v1613_v29 = vld [vmem:[%s2005_s11 + $0x78] sm:$0xf0] (%p740_p7) }
 0x481   : > { %v853_v9 = vadd.f32 (%p740_p7), %v851_v8, %v848_v7  ;;  %v1612_v28 = vor.u32 (%p740_p7), %v1720_v26, %v1611_v25  ;;  %v1616_v30 = vor.u32 (%p740_p7), %v1719_v27, %v1613_v29  ;;  %v1603_v31 = vld [vmem:[%s2005_s11 + $0x60] sm:$0xf] (%p740_p7)  ;;  %v1718_v32 = vld [vmem:[%s2005_s11 + $0x64] sm:$0xf0] (%p740_p7)  ;;  %v1717_v33 = vld [vmem:[%s2005_s11 + $0x64] sm:$0xf] (%p740_p7) }
 0x482   : >> { %840 = vmatpush.bf16.msra.mxu2 %v1703_v0  ;;  %v1595_v37 = vld [vmem:[%s2005_s11 + $0x50] sm:$0xf] (%p740_p7)  ;;  %v1712_v59 = vld [vmem:[%s2005_s11 + $0x34] sm:$0xf0] (%p740_p7)  ;;  %v1571_v0 = vld [vmem:[%s2005_s11 + $0x20] sm:$0xf] (%p740_p7) }
 0x483   : > { %v855_v10 = vadd.f32 (%p740_p7), %v853_v9, %v2051_v52  ;;  %v1579_v58 = vld [vmem:[%s2005_s11 + $0x30] sm:$0xf] (%p740_p7)  ;;  %v1708_v7 = vld [vmem:[%s2005_s11 + $0x14] sm:$0xf0] (%p740_p7)  ;;  %p1681_p8 = scmp.ge.s32.totalorder (%p740_p7), %s1981_s14, 1 }
 0x486   : >> { %1540 = vmatmul.msk.bf16.vlgmr.msra.gmra.mxu0 %vm642_vm8, %v1535_v38  ;;  %v1716_v38 = vld [vmem:[%s2005_s11 + $0x54] sm:$0xf0] (%p740_p7) }
 0x487   : > { %1016 = vmatpush.bf16.msra.mxu0 (%p740_p7), %v1612_v28 }
 0x503   : >> { %v773_v39 = vpop.f32.mrf.mxu0 }
 0x504   : >> { %v774_v40 = vadd.f32 %v1812_v34, %v773_v39  ;;  %v1604_v34 = vor.u32 (%p740_p7), %v1718_v32, %v1603_v31  ;;  %v1715_v39 = vld [vmem:[%s2005_s11 + $0x54] sm:$0xf] (%p740_p7) }
 0x506   : >> { %v778_v41 = vsel %vm662_vm9, %v774_v40, -inf  ;;  %1017 = vmatpush.bf16.msra.mxu0 (%p740_p7), %v1604_v34 }
 0x507   : >> { %779 = vmax.xlane.f32.xlu0 %v778_v41  ;;  %v1597_v41 = vld [vmem:[%s2005_s11 + $0x58] sm:$0xf0] (%p740_p7) }
 0x50b   : >> { %v775_v42 = vpop.f32.mrf.mxu0 }
 0x50c   : > { %v1600_v42 = vor.u32 (%p740_p7), %v1715_v39, %v1597_v41 }
 0x57a   : >> { %v780_v43 = vpop.xlane.xlu0 %779 }
 0x57b   : >> { %v781_v44 = vsub.f32 %v774_v40, %v780_v43  ;;  %v1596_v40 = vor.u32 (%p740_p7), %v1716_v38, %v1595_v37  ;;  %v1587_v43 = vld [vmem:[%s2005_s11 + $0x40] sm:$0xf] (%p740_p7)  ;;  %v905_v37 = vperm.slane (%p740_p7), %v2034_v46, 0 }
 0x57d   : >> { %v782_v54 = vmul.f32 1.442695, %v781_v44  ;;  %1018 = vmatpush.bf16.msra.mxu0 (%p740_p7), %v1596_v40  ;;  %v1714_v44 = vld [vmem:[%s2005_s11 + $0x44] sm:$0xf0] (%p740_p7) }
 0x57f   : >> { %1813 = vpow2.f32 %v782_v54  ;;  %v1713_v54 = vld [vmem:[%s2005_s11 + $0x44] sm:$0xf] (%p740_p7) }
 0x585   : >> { %v1814_v55 = vpop.eup %1813 }
 0x586   : >> { %v784_v56 = vsel %vm662_vm9, %v1814_v55, 0.0 }
 0x587   : >> { %785 = vadd.xlane.f32.xlu0 %v784_v56  ;;  %v1589_v56 = vld [vmem:[%s2005_s11 + $0x48] sm:$0xf0] (%p740_p7) }
 0x588   : > { %v1592_v57 = vor.u32 (%p740_p7), %v1713_v54, %v1589_v56  ;;  %v1728_v54 = vld [vmem:[%s2010_s17 + $0x38] sm:$0xff] (%p740_p7)  ;;  %v1726_v56 = vld [vmem:[%s2010_s17 + $0x28] sm:$0xff] (%p740_p7) }
 0x58f   : > { %857 = vadd.xlane.f32.xlu0 (%p740_p7), %v855_v10 }
 0x5fa   : >> { %v786_v60 = vpop.xlane.xlu0 %785 }
 0x5fb   : >> { %1815 = vrcp.f32 %v786_v60  ;;  %v1711_v60 = vld [vmem:[%s2005_s11 + $0x34] sm:$0xf] (%p740_p7) }
 0x5fc   : > { %1817 = vrcp.f32 (%p740_p7), %v1916_v13 }
 0x601   : >> { %v1816_v61 = vpop.eup %1815 }
 0x602   : >> { %v788_v62 = vmul.f32 %v1816_v61, %v1814_v55  ;;  %v1818_v14 = vpop.eup (%p740_p7), %1817  ;;  %v858_v52 = vpop.xlane.xlu0 (%p740_p7), %857  ;;  %v1588_v55 = vor.u32 (%p740_p7), %v1714_v44, %v1587_v43  ;;  %v1580_v61 = vor.u32 (%p740_p7), %v1712_v59, %v1579_v58  ;;  %v1725_v58 = vld [vmem:[%s2010_s17 + $0x20] sm:$0xff] (%p740_p7) }
 0x603   : > { %v862_v15 = vmul.f32 (%p740_p7), 128.0, %v1818_v14  ;;  %vm866_vm11 = vweird.f32 (%p740_p7), %v1818_v14  ;;  %v1733_v59 = vld [vmem:[%s2010_s17 + $0x60] sm:$0xff] (%p740_p7) }
 0x604   : >> { %v789_v63 = vpack.c.bf16 %v788_v62, %v788_v62  ;;  %1019 = vmatpush.bf16.msra.mxu0 (%p740_p7), %v1588_v55  ;;  %v1581_v62 = vld [vmem:[%s2005_s11 + $0x38] sm:$0xf0] (%p740_p7)  ;;  %v1735_v55 = vld [vmem:[%s2010_s17 + $0x70] sm:$0xff] (%p740_p7) }
 0x605   : > { %v863_v16 = vsub.f32 (%p740_p7), 1.0, %v862_v15  ;;  %v1557_v15 = vld [vmem:[%s2005_s11 + $0x8] sm:$0xf0] (%p740_p7) }
 0x606   : >> { %1541 = vmatmul.msk.bf16.vlgmr.msra.gmra.mxu1 %vm662_vm9, %v789_v63  ;;  %v1584_v63 = vor.u32 (%p740_p7), %v1711_v60, %v1581_v62  ;;  %v1724_v60 = vld [vmem:[%s2010_s17 + $0x18] sm:$0xff] (%p740_p7)  ;;  %v1723_v62 = vld [vmem:[%s2010_s17 + $0x10] sm:$0xff] (%p740_p7) }
 0x607   : > { %v864_v17 = vmul.f32 (%p740_p7), %v1818_v14, %v863_v16  ;;  %1030 = vmatpush.bf16.msra.mxu1 (%p740_p7), %v1616_v30 }
 0x608   : > { %1020 = vmatpush.bf16.msra.mxu0 (%p740_p7), %v1580_v61  ;;  %v1732_v61 = vld [vmem:[%s2010_s17 + $0x58] sm:$0xff] (%p740_p7) }
 0x609   : > { %v865_v18 = vadd.f32 (%p740_p7), %v1818_v14, %v864_v17 }
 0x60b   : > { %v2115_v45 = vsel (%p740_p7), %vm866_vm11, %v1818_v14, %v865_v18  ;;  %v1705_v14 = vld [vmem:[%s2005_s11 + $0x4] sm:$0xf] (%p740_p7) }
 0x60c   : > { %v868_v19 = vmul.f32 (%p740_p7), %v2115_v45, %v858_v52  ;;  %v1560_v52 = vor.u32 (%p740_p7), %v1705_v14, %v1557_v15 }
 0x60e   : > { %v2118_v20 = vsub.f32 (%p740_p7), %v855_v10, %v868_v19  ;;  %v1565_v10 = vld [vmem:[%s2005_s11 + $0x18] sm:$0xf0] (%p740_p7) }
 0x683   : >> { %v806_v1 = vpop.f32.mrf.mxu1 }
 0x684   : >> { %v810_v2 = vpack.c.bf16 %v806_v1, %v806_v1  ;;  %v1710_v1 = vld [vmem:[%s2005_s11 + $0x24] sm:$0xf0] (%p740_p7) }
 0x686   : >> { %1552 = vmatmul.msk.bf16.vlgmr.msra.gmra.mxu2 %vm642_vm8, %v810_v2  ;;  %v1709_v2 = vld [vmem:[%s2005_s11 + $0x24] sm:$0xf] (%p740_p7) }
 0x687   : > { %1213 = vmatpush.bf16.msra.mxu2 (%p740_p7), %v1728_v54 }
 0x68b   : >> { %v808_v3 = vpop.f32.mrf.mxu1 }
 0x68c   : > { %v1572_v3 = vor.u32 (%p740_p7), %v1710_v1, %v1571_v0  ;;  %v1722_v0 = vld [vmem:[%s2010_s17 + $0x8] sm:$0xff] (%p740_p7) }
 0x68d   : > { %v1730_v1 = vld [vmem:[%s2010_s17 + $0x48] sm:$0xff] (%p740_p7) }
 0x68e   : > { %1021 = vmatpush.bf16.msra.mxu0 (%p740_p7), %v1572_v3  ;;  %v1729_v3 = vld [vmem:[%s2010_s17 + $0x40] sm:$0xff] (%p740_p7) }
 0x709   : >> { %v842_v4 = vpop.f32.mrf.mxu2 }
 0x70a   : >> { %v846_v5 = vadd.f32 %v1909_v35, %v842_v4   ;;  %v1573_v4 = vld [vmem:[%s2005_s11 + $0x28] sm:$0xf0] (%p740_p7) }
 0x70c   : >> { %v1908_v35 = vmov %v846_v5   ;;  %v854_v11 = vadd.f32 (%p740_p7), %v851_v8, %v846_v5  ;;  %v1576_v5 = vor.u32 (%p740_p7), %v1709_v2, %v1573_v4  ;;  %v1707_v8 = vld [vmem:[%s2005_s11 + $0x14] sm:$0xf] (%p740_p7)  ;;  %v1721_v2 = vld [vmem:[%s2010_s17] sm:$0xff] (%p740_p7)  ;;  %v932_v4 = vperm.slane (%p740_p7), %v2040_v48, 0 }
 0x70d   : > { %742 = sbr.rel (!%p740_p7) target bundleno = 1147 (0x47b), region = 170  ;;  %v1605_v35 = vld [vmem:[%s2005_s11 + $0x68] sm:$0xf0] (%p740_p7)  ;;  %v1568_v13 = vor.u32 (%p740_p7), %v1707_v8, %v1565_v10 }
 0x70e   : > { %v856_v12 = vadd.f32 (%p740_p7), %v854_v11, %v2053_v53  ;;  %v872_v53 = vmul.f32 (%p740_p7), %v2118_v20, %v2118_v20  ;;  %v1608_v36 = vor.u32 (%p740_p7), %v1717_v33, %v1605_v35  ;;  %v1555_v11 = vld [vmem:[%s2005_s11] sm:$0xf] (%p740_p7) }
 0x710   : > { %859 = vadd.xlane.f32.xlu0 (%p740_p7), %v856_v12  ;;  %874 = vadd.xlane.f32.xlu1 (%p740_p7), %v872_v53 }
 0x711   : >> { %v844_v6 = vpop.f32.mrf.mxu2  ;;  %1031 = vmatpush.bf16.msra.mxu1 (%p740_p7), %v1608_v36 }
 0x712   : > { %v1563_v6 = vld [vmem:[%s2005_s11 + $0x10] sm:$0xf] }
 0x713   : > { %v1564_v9 = vor.u32 %v1708_v7, %v1563_v6 }
 0x715   : > { %1032 = vmatpush.bf16.msra.mxu1 %v1600_v42  ;;  %1022 = vmatpush.bf16.msra.mxu0 %v1564_v9  ;;  %v910_v42 = vperm.slane %v2037_v47, 0  ;;  %v1727_v47 = vld [vmem:[%s2010_s17 + $0x30] sm:$0xff] }
 0x716   : > { %1214 = vmatpush.bf16.msra.mxu2 %v1727_v47 }
 0x719   : > { %1033 = vmatpush.bf16.msra.mxu1 %v1592_v57  ;;  %v1734_v57 = vld [vmem:[%s2010_s17 + $0x68] sm:$0xff] }
 0x71a   : > { %1215 = vmatpush.bf16.msra.mxu2 %v1726_v56 }
 0x71d   : > { %1034 = vmatpush.bf16.msra.mxu1 %v1584_v63  ;;  %v1731_v63 = vld [vmem:[%s2010_s17 + $0x50] sm:$0xff] }
 0x71e   : > { %1216 = vmatpush.bf16.msra.mxu2 %v1725_v58  ;;  %v1115_v58 = vperm.slane %v2043_v49, 0 }
 0x721   : > { %1035 = vmatpush.bf16.msra.mxu1 %v1576_v5  ;;  %v933_v5 = vperm.slane %v2040_v48, 1 }
 0x722   : > { %1217 = vmatpush.bf16.msra.mxu2 %v1724_v60 }
 0x725   : > { %1036 = vmatpush.bf16.msra.mxu1 %v1568_v13 }
 0x726   : > { %1218 = vmatpush.bf16.msra.mxu2 %v1723_v62 }
 0x729   : > { %1037 = vmatpush.bf16.msra.mxu1 %v1560_v52 }
 0x72a   : > { %1219 = vmatpush.bf16.msra.mxu2 %v1722_v0 }
 0x72e   : > { %1220 = vmatpush.bf16.msra.mxu2 %v1721_v2 }
 0x783   : > { %v860_v21 = vpop.xlane.xlu0 %859  ;;  %v875_v16 = vpop.xlane.xlu1 %874 }
 0x784   : > { %v869_v22 = vmul.f32 %v2115_v45, %v860_v21  ;;  %v878_v18 = vmul.f32 %v875_v16, %v2115_v45 }
 0x786   : > { %v2123_v23 = vsub.f32 %v856_v12, %v869_v22  ;;  %v1706_v12 = vld [vmem:[%s2005_s11 + $0x4] sm:$0xf0]  ;;  %v880_v19 = vadd.f32 1e-12, %v878_v18 }
 0x787   : > { %v1556_v17 = vor.u32 %v1706_v12, %v1555_v11 }
 0x788   : > { %v873_v24 = vmul.f32 %v2123_v23, %v2123_v23  ;;  %1819 = vrsqrt.f32 %v880_v19  ;;  %vm888_vm13 = vweird.f32 %v880_v19 }
 0x789   : > { %1023 = vmatpush.bf16.msra.mxu0 %v1556_v17 }
 0x78a   : > { %876 = vadd.xlane.f32.xlu1 %v873_v24 }
 0x78e   : > { %v1820_v22 = vpop.eup %1819 }
 0x78f   : > { %v883_v25 = vmul.f32 %v1820_v22, %v880_v19  ;;  %vm889_vm12 = vweird.f32 %v1820_v22 }
 0x790   : > { %vm890_vm14 = vmor %vm888_vm13, %vm889_vm12 }
 0x791   : > { %v884_v26 = vmul.f32 %v1820_v22, %v883_v25 }
 0x793   : > { %v885_v27 = vmul.f32 0.5, %v884_v26 }
 0x795   : > { %v886_v28 = vsub.f32 1.5, %v885_v27 }
 0x797   : > { %v887_v30 = vmul.f32 %v1820_v22, %v886_v28 }
 0x799   : > { %v891_v34 = vsel %vm890_vm14, %v1820_v22, %v887_v30 }
 0x79a   : > { %v902_v36 = vmul.f32 %v891_v34, %v2118_v20 }
 0x79c   : > { %v907_v41 = vmul.f32 %v905_v37, %v902_v36 }
 0x79e   : > { %v2165_v44 = vadd.f32 %v910_v42, %v907_v41 }
 0x7fd   : > { %v877_v53 = vpop.xlane.xlu1 %876 }
 0x7fe   : > { %v879_v21 = vmul.f32 %v877_v53, %v2115_v45 }
 0x800   : > { %v881_v24 = vadd.f32 1e-12, %v879_v21 }
 0x802   : > { %1821 = vrsqrt.f32 %v881_v24  ;;  %vm898_vm0 = vweird.f32 %v881_v24 }
 0x808   : > { %v1822_v29 = vpop.eup %1821 }
 0x809   : > { %v893_v31 = vmul.f32 %v1822_v29, %v881_v24  ;;  %vm899_vm15 = vweird.f32 %v1822_v29 }
 0x80a   : > { %vm900_vm1 = vmor %vm898_vm0, %vm899_vm15 }
 0x80b   : > { %v894_v32 = vmul.f32 %v1822_v29, %v893_v31 }
 0x80d   : > { %v895_v33 = vmul.f32 0.5, %v894_v32 }
 0x80f   : > { %v896_v35 = vsub.f32 1.5, %v895_v33 }
 0x811   : > { %v897_v38 = vmul.f32 %v1822_v29, %v896_v35 }
 0x813   : > { %v901_v39 = vsel %vm900_vm1, %v1822_v29, %v897_v38 }
 0x814   : > { %v903_v40 = vmul.f32 %v901_v39, %v2123_v23  ;;  %v1736_v23 = vld [vmem:[%s2010_s17 + $0x78] sm:$0xff] }
 0x815   : > { %1227 = vmatpush.bf16.msra.mxu3 %v1736_v23 }
 0x816   : > { %v908_v43 = vmul.f32 %v905_v37, %v903_v40 }
 0x818   : > { %v2167_v20 = vadd.f32 %v910_v42, %v908_v43 }
 0x819   : > { %1228 = vmatpush.bf16.msra.mxu3 %v1735_v55 }
 0x81a   : > { %v914_v46 = vpack.c.bf16 %v2167_v20, %v2165_v44 }
 0x81c   : > { %1024 = vmatmul.bf16.vlgmr.msra.gmra.mxu0 %v914_v46  ;;  %1038 = vmatmul.bf16.vlgmr.msra.gmra.mxu1 %v914_v46 }
 0x81d   : > { %1229 = vmatpush.bf16.msra.mxu3 %v1734_v57 }
 0x821   : > { %1230 = vmatpush.bf16.msra.mxu3 %v1733_v59 }
 0x825   : > { %1231 = vmatpush.bf16.msra.mxu3 %v1732_v61 }
 0x829   : > { %1232 = vmatpush.bf16.msra.mxu3 %v1731_v63 }
 0x82d   : > { %1233 = vmatpush.bf16.msra.mxu3 %v1730_v1 }
 0x831   : > { %1234 = vmatpush.bf16.msra.mxu3 %v1729_v3 }
 0x899   : > { %v1025_v6 = vpop.f32.mrf.mxu0  ;;  %v1039_v7 = vpop.f32.mrf.mxu1 }
 0x89a   : > { %v1026_v8 = vadd.f32 %v1025_v6, %v932_v4  ;;  %v1040_v9 = vadd.f32 %v1039_v7, %v933_v5 }
 0x89c   : > { %v1048_v10 = vmul.f32 0.044715, %v1026_v8  ;;  %v1049_v11 = vmul.f32 0.044715, %v1040_v9  ;;  %v1044_v39 = vmul.f32 0.5, %v1026_v8  ;;  %v1045_v42 = vmul.f32 0.5, %v1040_v9 }
 0x89e   : > { %v1052_v12 = vmul.f32 %v1048_v10, %v1026_v8  ;;  %v1053_v13 = vmul.f32 %v1049_v11, %v1040_v9 }
 0x8a0   : > { %v1056_v14 = vmul.f32 %v1052_v12, %v1026_v8  ;;  %v1057_v15 = vmul.f32 %v1053_v13, %v1040_v9 }
 0x8a1   : > { %v1027_v16 = vpop.f32.mrf.mxu0  ;;  %v1041_v17 = vpop.f32.mrf.mxu1 }
 0x8a2   : > { %v1028_v18 = vadd.f32 %v1027_v16, %v932_v4  ;;  %v1042_v52 = vadd.f32 %v1041_v17, %v933_v5  ;;  %v1060_v19 = vadd.f32 %v1056_v14, %v1026_v8  ;;  %v1061_v53 = vadd.f32 %v1057_v15, %v1040_v9 }
 0x8a4   : > { %v1050_v21 = vmul.f32 0.044715, %v1028_v18  ;;  %v1051_v48 = vmul.f32 0.044715, %v1042_v52  ;;  %v1064_v24 = vmul.f32 0.7978846, %v1060_v19 }
 0x8a5   : > { %v1065_v26 = vmul.f32 0.7978846, %v1061_v53  ;;  %v1046_v40 = vmul.f32 0.5, %v1028_v18  ;;  %v1047_v43 = vmul.f32 0.5, %v1042_v52 }
 0x8a6   : > { %v1054_v22 = vmul.f32 %v1050_v21, %v1028_v18  ;;  %v1055_v25 = vmul.f32 %v1051_v48, %v1042_v52  ;;  %1823 = vtanh.f32 %v1064_v24 }
 0x8a7   : > { %1825 = vtanh.f32 %v1065_v26  ;;  %v1289_v26 = vperm.slane %v2049_v51, 0 }
 0x8a8   : > { %v1058_v27 = vmul.f32 %v1054_v22, %v1028_v18  ;;  %v1059_v28 = vmul.f32 %v1055_v25, %v1042_v52  ;;  %v1284_v22 = vperm.slane %v2046_v50, 0 }
 0x8aa   : > { %v1062_v29 = vadd.f32 %v1058_v27, %v1028_v18  ;;  %v1063_v30 = vadd.f32 %v1059_v28, %v1042_v52 }
 0x8ac   : > { %v1066_v31 = vmul.f32 0.7978846, %v1062_v29  ;;  %v1067_v32 = vmul.f32 0.7978846, %v1063_v30  ;;  %v1824_v33 = vpop.eup %1823 }
 0x8ad   : > { %v1826_v34 = vpop.eup %1825  ;;  %v1072_v35 = vadd.f32 1.0, %v1824_v33 }
 0x8ae   : > { %1827 = vtanh.f32 %v1066_v31  ;;  %v1073_v37 = vadd.f32 1.0, %v1826_v34 }
 0x8af   : > { %1829 = vtanh.f32 %v1067_v32  ;;  %v1076_v54 = vmul.f32 %v1072_v35, %v1044_v39 }
 0x8b0   : > { %v1077_v47 = vmul.f32 %v1073_v37, %v1045_v42 }
 0x8b4   : > { %v1828_v36 = vpop.eup %1827 }
 0x8b5   : > { %v1830_v38 = vpop.eup %1829  ;;  %v1074_v41 = vadd.f32 1.0, %v1828_v36 }
 0x8b6   : > { %v1075_v46 = vadd.f32 1.0, %v1830_v38 }
 0x8b7   : > { %v1078_v23 = vmul.f32 %v1074_v41, %v1046_v40 }
 0x8b8   : > { %v1079_v55 = vmul.f32 %v1075_v46, %v1047_v43 }
 0x8b9   : > { %v1080_v56 = vpack.c.bf16 %v1078_v23, %v1076_v54 }
 0x8ba   : > { %v1081_v57 = vpack.c.bf16 %v1079_v55, %v1077_v47 }
 0x8bb   : > { %1221 = vmatmul.bf16.vlgmr.msra.gmra.mxu2 %v1080_v56 }
 0x8bc   : > { %1235 = vmatmul.bf16.vlgmr.msra.gmra.mxu3 %v1081_v57 }
 0x93e   : > { %v1222_v59 = vpop.f32.mrf.mxu2 }
 0x93f   : > { %v1223_v60 = vadd.f32 %v1222_v59, %v1115_v58  ;;  %v1236_v61 = vpop.f32.mrf.mxu3 }
 0x941   : > { %v1237_v62 = vadd.f32 %v1236_v61, %v1223_v60 }
 0x943   : > { %v1241_v63 = vadd.f32 %v1237_v62, %v2165_v44 }
 0x945   : > { %1243 = vadd.xlane.f32.xlu2 %v1241_v63 }
 0x946   : > { %v1224_v0 = vpop.f32.mrf.mxu2 }
 0x947   : > { %v1225_v1 = vadd.f32 %v1224_v0, %v1115_v58  ;;  %v1238_v2 = vpop.f32.mrf.mxu3 }
 0x949   : > { %v1239_v3 = vadd.f32 %v1238_v2, %v1225_v1 }
 0x94b   : > { %v1242_v4 = vadd.f32 %v1239_v3, %v2167_v20 }
 0x94d   : > { %1245 = vadd.xlane.f32.xlu2 %v1242_v4 }
 0x9b8   : > { %v1244_v5 = vpop.xlane.xlu2 %1243 }
 0x9b9   : > { %v1247_v6 = vmul.f32 %v1244_v5, %v2115_v45 }
 0x9bb   : > { %v1249_v7 = vsub.f32 %v1241_v63, %v1247_v6 }
 0x9bd   : > { %v1251_v8 = vmul.f32 %v1249_v7, %v1249_v7 }
 0x9bf   : > { %1253 = vadd.xlane.f32.xlu0 %v1251_v8 }
 0x9c0   : > { %v1246_v49 = vpop.xlane.xlu2 %1245 }
 0x9c1   : > { %v1248_v9 = vmul.f32 %v1246_v49, %v2115_v45 }
 0x9c3   : > { %v1250_v10 = vsub.f32 %v1242_v4, %v1248_v9 }
 0x9c5   : > { %v1252_v11 = vmul.f32 %v1250_v10, %v1250_v10 }
 0x9c7   : > { %1255 = vadd.xlane.f32.xlu1 %v1252_v11 }
 0xa32   : > { %v1254_v44 = vpop.xlane.xlu0 %1253 }
 0xa33   : > { %v1257_v12 = vmul.f32 %v1254_v44, %v2115_v45 }
 0xa35   : > { %v1259_v13 = vadd.f32 1e-12, %v1257_v12 }
 0xa37   : > { %1831 = vrsqrt.f32 %v1259_v13  ;;  %vm1267_vm3 = vweird.f32 %v1259_v13 }
 0xa3a   : > { %v1256_v14 = vpop.xlane.xlu1 %1255 }
 0xa3b   : > { %v1258_v20 = vmul.f32 %v1256_v14, %v2115_v45 }
 0xa3d   : > { %v1832_v15 = vpop.eup %1831  ;;  %v1260_v16 = vadd.f32 1e-12, %v1258_v20 }
 0xa3e   : > { %v1262_v17 = vmul.f32 %v1832_v15, %v1259_v13  ;;  %vm1268_vm2 = vweird.f32 %v1832_v15 }
 0xa3f   : > { %1833 = vrsqrt.f32 %v1260_v16  ;;  %vm1269_vm4 = vmor %vm1267_vm3, %vm1268_vm2  ;;  %vm1277_vm6 = vweird.f32 %v1260_v16 }
 0xa40   : > { %v1263_v18 = vmul.f32 %v1832_v15, %v1262_v17 }
 0xa42   : > { %v1264_v52 = vmul.f32 0.5, %v1263_v18 }
 0xa44   : > { %v1265_v19 = vsub.f32 1.5, %v1264_v52 }
 0xa45   : > { %v1834_v53 = vpop.eup %1833 }
 0xa46   : > { %v1266_v21 = vmul.f32 %v1832_v15, %v1265_v19  ;;  %v1272_v48 = vmul.f32 %v1834_v53, %v1260_v16  ;;  %vm1278_vm5 = vweird.f32 %v1834_v53 }
 0xa47   : > { %vm1279_vm7 = vmor %vm1277_vm6, %vm1278_vm5 }
 0xa48   : > { %v1270_v24 = vsel %vm1269_vm4, %v1832_v15, %v1266_v21  ;;  %v1273_v25 = vmul.f32 %v1834_v53, %v1272_v48 }
 0xa49   : > { %v1281_v45 = vmul.f32 %v1270_v24, %v1249_v7 }
 0xa4a   : > { %v1274_v27 = vmul.f32 0.5, %v1273_v25 }
 0xa4b   : > { %v1286_v28 = vmul.f32 %v1284_v22, %v1281_v45 }
 0xa4c   : > { %v1275_v29 = vsub.f32 1.5, %v1274_v27 }
 0xa4d   : > { %v1291_v30 = vadd.f32 %v1289_v26, %v1286_v28 }
 0xa4e   : > { %v1276_v31 = vmul.f32 %v1834_v53, %v1275_v29 }
 0xa50   : > { %v1280_v32 = vsel %vm1279_vm7, %v1834_v53, %v1276_v31 }
 0xa51   : > { %v1282_v33 = vmul.f32 %v1280_v32, %v1250_v10  ;;  %1296 = sbr.rel (%p1681_p8) target bundleno = 2648 (0xa58), region = 89 }
 0xa53   : > { %v1287_v34 = vmul.f32 %v1284_v22, %v1282_v33 }
 0xa55   : > { %v1292_v35 = vadd.f32 %v1289_v26, %v1287_v34 }
 0xa56   : > { %1297 = vst [vmem:[#allocation2] sm:$0xff] %v1291_v30 }
 0xa57   : > { %1298 = vst [vmem:[#allocation2 + $0x8] sm:$0xff] %v1292_v35 }
 0xa58 PF: > { %p1682_p9 = scmp.ne.s32.totalorder %s1981_s14, 1 }
 0xa5a   : > { %1302 = sbr.rel (%p1682_p9) target bundleno = 2657 (0xa61), region = 93 }
 0xa5f   : > { %1303 = vst [vmem:[#allocation5] sm:$0xff] %v1291_v30 }
 0xa60   : > { %1304 = vst [vmem:[#allocation5 + $0x8] sm:$0xff] %v1292_v35 }
 0xa61 PF: > { %p1743_p10 = scmp.eq.s32.totalorder %s1981_s14, 1  ;;  %s1917_s21 = smov [#allocation5]  }
 0xa62   : > { %s1310_s11 = sshll.u32 %s1917_s21, 4  ;;  %s1312_s26 = sshll.u32 %s2217_s10, 4  ;;  %s1311_s11 = int_to_ptr.vmem [resolvable:$true] %s1310_s11  ;;  %s1313_s26 = int_to_ptr.hbm [resolvable:$true] %s1312_s26 }
 0xa63   : > { %s1918_s27 = smov 128   ;;  %s1919_s29 = smov 8  }
 0xa64   : > { %1740 = dma.vmem_to_hbm [thread:$0]  (%p1743_p10), %s1311_s11, 256, %s1313_s26, [#allocation6], %s1918_s27, %s1918_s27, %s1919_s29  }
 0xa65   : > { %1888 = dma.done.wait (%p1743_p10), [#allocation6], 256  }
 0xa66   : > { %1890 = vsyncadd (%p1743_p10), [#allocation6], 4294967040 }
 0xa67 PF: > { %s21_s13 = sadd.s32 1, %s1893_s13  }
 0xa68   : > { %p18_p11 = scmp.ge.s32.totalorder %s21_s13, 4  }
 0xa6a   :  { %20 = sbr.rel (!%p18_p11) target bundleno = 1 (0x1), region = 181 }
 0xa6f   :  { %1329 = vsyncpa [#allocation6], 1 }
 0xa70   :  { %1331 = vsyncpa [#allocation6 + $0x1], 1 }

</bundles_post_ra>
